<compile_context>
chip_gen: v7x
topology: tpu7x:2x2x1
jax: 0.10.0
libtpu: 0.0.40
codegen_flags: <defaults>
</compile_context>

<pallas_src>
import jax
import jax.numpy as jnp
from jax.experimental import pallas as pl
from jax.experimental.pallas import tpu as pltpu

_BIG = 1.0e30          # finite stand-in for +inf in additive masks
_NEG_THRESH = -1.0e29  # running max below this == "segment empty so far"


def _weighted_sum_partial_kernel(
    x_ref, mt_ref, wst_ref, ws2r_ref, wt2_ref, rgh_ref, r2_ref,
    m_out, d_out, n_out, m_acc, d_acc, n_acc):
  """Pass 1: per-core partial (max, denom, numerator) of the weighted-sum
  graph representation, online segment softmax in lane-dense [TV, G*H]."""
  f32, bf16 = jnp.float32, jnp.bfloat16
  i = pl.program_id(1)

  @pl.when(i == 0)
  def _init():
    m_acc[...] = jnp.full(m_acc.shape, -_BIG, dtype=m_acc.dtype)
    d_acc[...] = jnp.zeros_like(d_acc)
    n_acc[...] = jnp.zeros_like(n_acc)

  x = x_ref[...]                      # [TV, F]    bf16 node embeddings (tile)
  mt = mt_ref[...]                    # [TV, G]    bf16 one-hot membership M^T
  rgh = rgh_ref[...]                  # [G, G*H]   bf16 graph -> (graph,head)
  r2 = r2_ref[...]                    # [G*H, Dg]  bf16 (graph,head) -> feature

  # fused scoring|transformation first layer: one K=F, N=SH+TH bf16 matmul
  h_cat = jnp.maximum(jnp.dot(x, wst_ref[...], preferred_element_type=f32), 0.0)
  sh = ws2r_ref.shape[0]
  s_h = h_cat[:, :sh].astype(bf16)
  t_h = h_cat[:, sh:].astype(bf16)
  # scores replicated per graph: ws2_rep[k, g*H + h] = ws2[k, h]
  scores_gh = jnp.dot(s_h, ws2r_ref[...], preferred_element_type=f32)  # [TV,GH]
  values = jnp.dot(t_h, wt2_ref[...], preferred_element_type=f32)      # [TV,Dg]

  # lane-dense masked scores: masked[v, g*H+h] = scores[v,h] if v in g else -BIG
  memb = jnp.dot(mt, rgh, preferred_element_type=f32)                  # exact 0/1
  masked = scores_gh + (memb - 1.0) * _BIG                             # [TV, GH]

  # ---- online per-(graph, head) softmax state, flat on lanes [1, G*H] ----
  m_tile = jnp.max(masked, axis=0, keepdims=True)                      # [1, GH]
  m_prev = m_acc[...]
  m_new = jnp.maximum(m_prev, m_tile)
  scale = jnp.exp(m_prev - m_new)                                      # [1, GH]
  # keep exp finite for graphs with no members so far (masked == -BIG anyway)
  m_used = jnp.where(m_new > _NEG_THRESH, m_new, 0.0)
  p = jnp.exp(masked - m_used)                 # [TV, GH]; exactly 0 off-segment
  p16 = p.astype(bf16)

  d_acc[...] = d_acc[...] * scale + jnp.sum(p16.astype(f32), axis=0,
                                            keepdims=True)

  # expand per-node weights to the feature axis via the one-hot [GH, Dg] map
  w_pn = jnp.dot(p16, r2, preferred_element_type=f32)                  # [TV, Dg]
  # numerator contribution: MT^T @ (weights * values), bf16 MXU, f32 acc
  contrib = jax.lax.dot_general(
      mt, (w_pn * values).astype(bf16), (((0,), (0,)), ((), ())),
      preferred_element_type=f32)                                      # [G, Dg]
  # exact [G, Dg] expansion of the rescale factor (tiny f32 one-hot selection)
  scale_exp = jnp.dot(rgh.astype(f32) * scale, r2.astype(f32),
                      preferred_element_type=f32)                      # [G, Dg]
  n_acc[...] = n_acc[...] * scale_exp + contrib
  m_acc[...] = m_new

  @pl.when(i == pl.num_programs(1) - 1)
  def _finalize():
    m_out[0] = m_acc[...]
    d_out[0] = d_acc[...]
    n_out[0] = n_acc[...]


def _lift_mlp_kernel(
    x_ref, mt_ref, gr_ref, w1_ref, b1_ref, w2_ref, b2_ref, w3_ref, b3_ref,
    w4_ref, b4_ref, out_ref):
  """Pass 2 (node-parallel): lift graph repr back to nodes, run MLP4Layer."""
  f32, bf16 = jnp.float32, jnp.bfloat16
  x = x_ref[...]                                   # [TV, F]  bf16
  mt = mt_ref[...]                                 # [TV, G]  bf16 one-hot
  # index_select(node_to_graph_map) == one-hot MT @ graph_repr (exact, bf16 MXU)
  per_node = jnp.dot(mt, gr_ref[...], preferred_element_type=f32)      # [TV, Dg]
  # dropout -> identity (inference semantics)

  # MLP4Layer on concat([per_node_graph_repr, node_embeddings]); first layer
  # fused along K with a stacked [Dg+F, MH] weight (fills the 256-deep MXU).
  xcat = jnp.concatenate([per_node.astype(bf16), x], axis=-1)          # [TV, Dg+F]
  h1 = jnp.maximum(jnp.dot(xcat, w1_ref[...], preferred_element_type=f32)
                   + b1_ref[...], 0.0)
  h2 = jnp.maximum(jnp.dot(h1.astype(bf16), w2_ref[...],
                           preferred_element_type=f32) + b2_ref[...], 0.0)
  h3 = jnp.maximum(jnp.dot(h2.astype(bf16), w3_ref[...],
                           preferred_element_type=f32) + b3_ref[...], 0.0)
  out = jnp.dot(h3.astype(bf16), w4_ref[...],
                preferred_element_type=f32) + b4_ref[...]
  out_ref[...] = out.astype(out_ref.dtype)


def graph_global_mlp_exchange(node_embeddings, node_to_graph_map, num_graphs,
                              params, *, block_v1=256, block_v2=512):
  """GraphGlobalMLPExchange forward: two tiled Pallas passes."""
  V, F = node_embeddings.shape
  G = num_graphs
  H = params["num_heads"]
  Dg = params["num_graph_features"]
  assert Dg % H == 0
  chunk = Dg // H
  GH = G * H
  assert V % block_v1 == 0 and V % block_v2 == 0, "pad V to the block sizes"
  tiles1 = V // block_v1
  tiles2 = V // block_v2
  num_cores = 2 if (tiles1 % 2 == 0 and tiles1 >= 2) else 1  # v7x: 2 TCs/chip
  tpc = tiles1 // num_cores

  bf16, f32 = jnp.bfloat16, jnp.float32
  SH = params["ws1"].shape[1]
  TH = params["wt1"].shape[1]
  MH = params["w2"].shape[0]

  x = node_embeddings.astype(bf16)
  # transposed one-hot membership [V, G]; 0/1 exact in bf16
  mt = (node_to_graph_map[:, None] ==
        jnp.arange(G, dtype=node_to_graph_map.dtype)[None, :]).astype(bf16)

  # fused / replicated weights (exact transforms, done once in the wrapper)
  w_st = jnp.concatenate([params["ws1"], params["wt1"]], axis=1).astype(bf16)
  ws2_rep = jnp.tile(params["ws2"], (1, G)).astype(bf16)        # [SH, G*H]
  wt2 = params["wt2"].astype(bf16)                              # [TH, Dg]
  rgh = jnp.repeat(jnp.eye(G, dtype=f32), H, axis=1).astype(bf16)   # [G, G*H]
  e_hd = (jnp.arange(Dg)[None, :] // chunk ==
          jnp.arange(H)[:, None]).astype(f32)                   # [H, Dg]
  r2 = jnp.tile(e_hd, (G, 1)).astype(bf16)                      # [G*H, Dg]

  resident1 = lambda shape: pl.BlockSpec(shape, lambda i: (0, 0))
  resident2 = lambda shape: pl.BlockSpec(shape, lambda c, i: (0, 0))
  cparams = lambda sem: pltpu.CompilerParams(
      dimension_semantics=sem, vmem_limit_bytes=32 * 1024 * 1024)

  # ---- pass 1: per-core partial weighted-sum representations ----
  m_part, d_part, n_part = pl.pallas_call(
      _weighted_sum_partial_kernel,
      out_shape=(jax.ShapeDtypeStruct((num_cores, 1, GH), f32),
                 jax.ShapeDtypeStruct((num_cores, 1, GH), f32),
                 jax.ShapeDtypeStruct((num_cores, G, Dg), f32)),
      grid=(num_cores, tpc),
      in_specs=[
          pl.BlockSpec((block_v1, F), lambda c, i: (c * tpc + i, 0)),  # x
          pl.BlockSpec((block_v1, G), lambda c, i: (c * tpc + i, 0)),  # M^T
          resident2((F, SH + TH)),                                     # ws1|wt1
          resident2((SH, GH)),                                         # ws2_rep
          resident2((TH, Dg)),                                         # wt2
          resident2((G, GH)),                                          # rgh
          resident2((GH, Dg)),                                         # r2
      ],
      out_specs=(pl.BlockSpec((1, 1, GH), lambda c, i: (c, 0, 0)),
                 pl.BlockSpec((1, 1, GH), lambda c, i: (c, 0, 0)),
                 pl.BlockSpec((1, G, Dg), lambda c, i: (c, 0, 0))),
      scratch_shapes=[pltpu.VMEM((1, GH), f32),    # running per-(graph,head) max
                      pltpu.VMEM((1, GH), f32),    # running softmax denominator
                      pltpu.VMEM((G, Dg), f32)],   # running weighted-sum numerator
      compiler_params=cparams(("parallel", "arbitrary")),
  )(x, mt, w_st, ws2_rep, wt2, rgh, r2)

  # ---- merge per-core partials (tiny [G, *] arrays; exact LSE combine) ----
  m_c = m_part[:, 0, :]                                   # [NC, GH]
  d_c = d_part[:, 0, :]
  m_all = jnp.max(m_c, axis=0)                            # [GH]
  fac = jnp.exp(m_c - m_all[None, :])                     # [NC, GH]
  d_all = jnp.sum(d_c * fac, axis=0)                      # [GH]
  fac_gd = jnp.repeat(fac.reshape(num_cores, G, H), chunk, axis=2).reshape(
      num_cores, G, Dg)
  n_all = jnp.sum(n_part * fac_gd, axis=0)                # [G, Dg]
  d_gd = jnp.repeat(d_all.reshape(G, H), chunk, axis=1)   # [G, Dg]
  graph_repr = jnp.where(d_gd > 0.0, n_all / jnp.maximum(d_gd, 1e-30), 0.0)

  # ---- pass 2: lift to nodes + MLP4Layer (node-parallel, bf16 output) ----
  w1 = jnp.concatenate([params["w1g"], params["w1x"]], axis=0).astype(bf16)
  out = pl.pallas_call(
      _lift_mlp_kernel,
      out_shape=jax.ShapeDtypeStruct((V, F), bf16),
      grid=(tiles2,),
      in_specs=[
          pl.BlockSpec((block_v2, F), lambda i: (i, 0)),   # x: node tiles
          pl.BlockSpec((block_v2, G), lambda i: (i, 0)),   # M^T: node tiles
          resident1((G, Dg)),                              # graph representations
          resident1((Dg + F, MH)), resident1((1, MH)),
          resident1((MH, MH)), resident1((1, MH)),
          resident1((MH, MH)), resident1((1, MH)),
          resident1((MH, F)), resident1((1, F)),
      ],
      out_specs=pl.BlockSpec((block_v2, F), lambda i: (i, 0)),
      compiler_params=cparams(("parallel",)),
  )(x, mt, graph_repr.astype(bf16), w1, params["b1"],
    params["w2"].astype(bf16), params["b2"],
    params["w3"].astype(bf16), params["b3"],
    params["w4"].astype(bf16), params["b4"])
  return out


def _make_params(key, num_graph_features, num_node_features, num_heads,
                 scoring_hidden, transform_hidden, mlp_hidden):
  """Deterministic synthetic parameters (no checkpoint load)."""
  ks = jax.random.split(key, 13)
  f32 = jnp.float32

  def w(k, shape, scale=0.1):
    return (scale * jax.random.normal(k, shape)).astype(f32)

  F, Dg, H = num_node_features, num_graph_features, num_heads
  return {
      "num_heads": H,
      "num_graph_features": Dg,
      # WeightedSumGraphRepresentation
      "ws1": w(ks[0], (F, scoring_hidden)),
      "ws2": w(ks[1], (scoring_hidden, H)),
      "wt1": w(ks[2], (F, transform_hidden)),
      "wt2": w(ks[3], (transform_hidden, Dg)),
      # MLP4Layer on (Dg + F) -> F ; first layer split row-wise (graph / node)
      "w1g": w(ks[4], (Dg, mlp_hidden)),
      "w1x": w(ks[5], (F, mlp_hidden)),
      "b1": w(ks[6], (1, mlp_hidden)),
      "w2": w(ks[7], (mlp_hidden, mlp_hidden)),
      "b2": w(ks[8], (1, mlp_hidden)),
      "w3": w(ks[9], (mlp_hidden, mlp_hidden)),
      "b3": w(ks[10], (1, mlp_hidden)),
      "w4": w(ks[11], (mlp_hidden, F)),
      "b4": w(ks[12], (1, F)),
  }


def _reference(node_embeddings, node_to_graph_map, num_graphs, params):
  """Pure-JAX reference (real segment ops, same bf16-matmul precision)."""
  bf16, f32 = jnp.bfloat16, jnp.float32
  x = node_embeddings.astype(bf16)
  V, F = x.shape
  G = num_graphs
  H, Dg = params["num_heads"], params["num_graph_features"]
  chunk = Dg // H
  relu = lambda a: jnp.maximum(a, 0.0)
  dot = lambda a, b: jnp.dot(a.astype(bf16), b.astype(bf16),
                             preferred_element_type=f32)

  scores = dot(relu(dot(x, params["ws1"])), params["ws2"])           # [V, H]
  seg_max = jax.ops.segment_max(scores, node_to_graph_map, num_segments=G)
  exp_s = jnp.exp(scores - seg_max[node_to_graph_map])
  denom = jax.ops.segment_sum(exp_s, node_to_graph_map, num_segments=G)
  weights = exp_s / denom[node_to_graph_map]                         # [V, H]

  values = dot(relu(dot(x, params["wt1"])), params["wt2"])           # [V, Dg]
  wv = (weights[:, :, None] * values.reshape(V, H, chunk)).reshape(V, Dg)
  graph_repr = jax.ops.segment_sum(wv, node_to_graph_map, num_segments=G)
  per_node = graph_repr[node_to_graph_map]                           # [V, Dg]

  h1 = relu(dot(per_node, params["w1g"]) + dot(x, params["w1x"]) + params["b1"])
  h2 = relu(dot(h1, params["w2"]) + params["b2"])
  h3 = relu(dot(h2, params["w3"]) + params["b3"])
  return dot(h3, params["w4"]) + params["b4"]


if __name__ == "__main__":
  # deterministic example: 1024 nodes over 8 graphs, lane-dense widths
  V, G = 1024, 8          # total nodes, number of graphs
  F, Dg, H = 128, 128, 8  # num_node_features, num_graph_features, num_heads
  SH = TH = MH = 128      # hidden widths (MXU-friendly)

  key = jax.random.PRNGKey(0)
  k_x, k_p, k_m = jax.random.split(key, 3)
  node_embeddings = jax.random.normal(k_x, (V, F), dtype=jnp.float32)
  ids = jnp.repeat(jnp.arange(G, dtype=jnp.int32), V // G)
  node_to_graph_map = jax.random.permutation(k_m, ids)   # interleave graphs

  params = _make_params(k_p, num_graph_features=Dg, num_node_features=F,
                        num_heads=H, scoring_hidden=SH, transform_hidden=TH,
                        mlp_hidden=MH)

  out = graph_global_mlp_exchange(node_embeddings, node_to_graph_map, G,
                                  params, block_v1=256, block_v2=512)
  out = jax.block_until_ready(out)

  ref = _reference(node_embeddings, node_to_graph_map, G, params)
  assert out.shape == (V, F)
  assert out.dtype == jnp.bfloat16
  out_f32 = out.astype(jnp.float32)
  assert bool(jnp.all(jnp.isfinite(out_f32)))
  max_err = float(jnp.max(jnp.abs(out_f32 - ref)))
  assert jnp.allclose(out_f32, ref, atol=2e-2, rtol=2e-2), max_err
  print("KERNEL_OK")
</pallas_src>

<mosaic_0001>
module attributes {stable_mosaic.version = 11 : i64} {
  func.func @_weighted_sum_partial_kernel(%arg0: i32, %arg1: i32, %arg2: memref<256x128xbf16, #tpu.memory_space<vmem>>, %arg3: memref<256x8xbf16, #tpu.memory_space<vmem>>, %arg4: memref<128x256xbf16, #tpu.memory_space<vmem>>, %arg5: memref<128x64xbf16, #tpu.memory_space<vmem>>, %arg6: memref<128x128xbf16, #tpu.memory_space<vmem>>, %arg7: memref<8x64xbf16, #tpu.memory_space<vmem>>, %arg8: memref<64x128xbf16, #tpu.memory_space<vmem>>, %arg9: memref<1x1x64xf32, #tpu.memory_space<vmem>>, %arg10: memref<1x1x64xf32, #tpu.memory_space<vmem>>, %arg11: memref<1x8x128xf32, #tpu.memory_space<vmem>>, %arg12: memref<1x64xf32, #tpu.memory_space<vmem>>, %arg13: memref<1x64xf32, #tpu.memory_space<vmem>>, %arg14: memref<8x128xf32, #tpu.memory_space<vmem>>) attributes {dimension_semantics = [#tpu.dimension_semantics<parallel>, #tpu.dimension_semantics<arbitrary>], iteration_bounds = array<i64: 2, 2>, scalar_prefetch = 0 : i64, scratch_operands = 3 : i64, tpu.core_type = #tpu.core_type<tc>, window_params = [{transform_indices = @transform_0, window_bounds = array<i64: 256, 128>}, {transform_indices = @transform_1, window_bounds = array<i64: 256, 8>}, {pipeline_mode = #tpu.pipeline_mode<synchronous>, transform_indices = @transform_2, window_bounds = array<i64: 128, 256>}, {pipeline_mode = #tpu.pipeline_mode<synchronous>, transform_indices = @transform_3, window_bounds = array<i64: 128, 64>}, {pipeline_mode = #tpu.pipeline_mode<synchronous>, transform_indices = @transform_4, window_bounds = array<i64: 128, 128>}, {pipeline_mode = #tpu.pipeline_mode<synchronous>, transform_indices = @transform_5, window_bounds = array<i64: 8, 64>}, {pipeline_mode = #tpu.pipeline_mode<synchronous>, transform_indices = @transform_6, window_bounds = array<i64: 64, 128>}, {transform_indices = @transform_7, window_bounds = array<i64: 1, 1, 64>}, {transform_indices = @transform_8, window_bounds = array<i64: 1, 1, 64>}, {transform_indices = @transform_9, window_bounds = array<i64: 1, 8, 128>}]} {
    %c0_i32 = arith.constant 0 : i32
    %0 = arith.cmpi eq, %arg1, %c0_i32 : i32
    %1 = arith.extui %0 : i1 to i32
    %c0_i32_0 = arith.constant 0 : i32
    %2 = arith.cmpi ne, %1, %c0_i32_0 : i32
    scf.if %2 {
      %cst_40 = arith.constant -1.000000e+30 : f32
      %63 = vector.broadcast %cst_40 : f32 to vector<1x64xf32>
      %c0_41 = arith.constant 0 : index
      %c0_42 = arith.constant 0 : index
      %64 = vector.load %arg12[%c0_41, %c0_42] : memref<1x64xf32, #tpu.memory_space<vmem>>, vector<1x64xf32>
      tpu.vector_store %arg12[%c0_41, %c0_42], %63 {strides = array<i32>} : memref<1x64xf32, #tpu.memory_space<vmem>>, vector<1x64xf32>,
      %cst_43 = arith.constant 0.000000e+00 : f32
      %65 = vector.broadcast %cst_43 : f32 to vector<1x64xf32>
      %c0_44 = arith.constant 0 : index
      %c0_45 = arith.constant 0 : index
      %66 = vector.load %arg13[%c0_44, %c0_45] : memref<1x64xf32, #tpu.memory_space<vmem>>, vector<1x64xf32>
      tpu.vector_store %arg13[%c0_44, %c0_45], %65 {strides = array<i32>} : memref<1x64xf32, #tpu.memory_space<vmem>>, vector<1x64xf32>,
      %cst_46 = arith.constant 0.000000e+00 : f32
      %67 = vector.broadcast %cst_46 : f32 to vector<8x128xf32>
      %c0_47 = arith.constant 0 : index
      %c0_48 = arith.constant 0 : index
      %68 = vector.load %arg14[%c0_47, %c0_48] : memref<8x128xf32, #tpu.memory_space<vmem>>, vector<8x128xf32>
      tpu.vector_store %arg14[%c0_47, %c0_48], %67 {strides = array<i32>} : memref<8x128xf32, #tpu.memory_space<vmem>>, vector<8x128xf32>,
    } else {
    }
    %c0 = arith.constant 0 : index
    %c0_1 = arith.constant 0 : index
    %3 = vector.load %arg2[%c0, %c0_1] : memref<256x128xbf16, #tpu.memory_space<vmem>>, vector<256x128xbf16>
    %c0_2 = arith.constant 0 : index
    %c0_3 = arith.constant 0 : index
    %4 = vector.load %arg3[%c0_2, %c0_3] : memref<256x8xbf16, #tpu.memory_space<vmem>>, vector<256x8xbf16>
    %c0_4 = arith.constant 0 : index
    %c0_5 = arith.constant 0 : index
    %5 = vector.load %arg7[%c0_4, %c0_5] : memref<8x64xbf16, #tpu.memory_space<vmem>>, vector<8x64xbf16>
    %c0_6 = arith.constant 0 : index
    %c0_7 = arith.constant 0 : index
    %6 = vector.load %arg8[%c0_6, %c0_7] : memref<64x128xbf16, #tpu.memory_space<vmem>>, vector<64x128xbf16>
    %c0_8 = arith.constant 0 : index
    %c0_9 = arith.constant 0 : index
    %7 = vector.load %arg4[%c0_8, %c0_9] : memref<128x256xbf16, #tpu.memory_space<vmem>>, vector<128x256xbf16>
    %cst = arith.constant dense<0.000000e+00> : vector<256x256xf32>
    %8 = tpu.matmul %3, %7, %cst {dimension_numbers = #tpu.dot_dimension_numbers<[1], [0], [0], [1], [0, 0, 1, 1], [], []>} : vector<256x128xbf16>, vector<128x256xbf16>, vector<256x256xf32> -> vector<256x256xf32>
    %cst_10 = arith.constant 0.000000e+00 : f32
    %9 = vector.broadcast %cst_10 : f32 to vector<256x256xf32>
    %10 = arith.maximumf %8, %9 : vector<256x256xf32>
    %11 = vector.extract_strided_slice %10 {offsets = [0, 0], sizes = [256, 128], strides = [1, 1]} : vector<256x256xf32> to vector<256x128xf32>
    %12 = arith.truncf %11 : vector<256x128xf32> to vector<256x128xbf16>
    %13 = vector.extract_strided_slice %10 {offsets = [0, 128], sizes = [256, 128], strides = [1, 1]} : vector<256x256xf32> to vector<256x128xf32>
    %14 = arith.truncf %13 : vector<256x128xf32> to vector<256x128xbf16>
    %c0_11 = arith.constant 0 : index
    %c0_12 = arith.constant 0 : index
    %15 = vector.load %arg5[%c0_11, %c0_12] : memref<128x64xbf16, #tpu.memory_space<vmem>>, vector<128x64xbf16>
    %cst_13 = arith.constant dense<0.000000e+00> : vector<256x64xf32>
    %16 = tpu.matmul %12, %15, %cst_13 {dimension_numbers = #tpu.dot_dimension_numbers<[1], [0], [0], [1], [0, 0, 1, 1], [], []>} : vector<256x128xbf16>, vector<128x64xbf16>, vector<256x64xf32> -> vector<256x64xf32>
    %c0_14 = arith.constant 0 : index
    %c0_15 = arith.constant 0 : index
    %17 = vector.load %arg6[%c0_14, %c0_15] : memref<128x128xbf16, #tpu.memory_space<vmem>>, vector<128x128xbf16>
    %cst_16 = arith.constant dense<0.000000e+00> : vector<256x128xf32>
    %18 = tpu.matmul %14, %17, %cst_16 {dimension_numbers = #tpu.dot_dimension_numbers<[1], [0], [0], [1], [0, 0, 1, 1], [], []>} : vector<256x128xbf16>, vector<128x128xbf16>, vector<256x128xf32> -> vector<256x128xf32>
    %cst_17 = arith.constant dense<0.000000e+00> : vector<256x64xf32>
    %19 = tpu.matmul %4, %5, %cst_17 {dimension_numbers = #tpu.dot_dimension_numbers<[1], [0], [0], [1], [0, 0, 1, 1], [], []>} : vector<256x8xbf16>, vector<8x64xbf16>, vector<256x64xf32> -> vector<256x64xf32>
    %cst_18 = arith.constant 1.000000e+00 : f32
    %20 = vector.broadcast %cst_18 : f32 to vector<256x64xf32>
    %21 = arith.subf %19, %20 : vector<256x64xf32>
    %cst_19 = arith.constant 1.000000e+30 : f32
    %22 = vector.broadcast %cst_19 : f32 to vector<256x64xf32>
    %23 = arith.mulf %21, %22 : vector<256x64xf32>
    %24 = arith.addf %16, %23 : vector<256x64xf32>
    %cst_20 = arith.constant dense<0xFF800000> : vector<64xf32>
    %25 = vector.multi_reduction <maximumf>, %24, %cst_20 [0] : vector<256x64xf32> to vector<64xf32>
    %26 = vector.shape_cast %25 : vector<64xf32> to vector<1x64xf32>
    %c0_21 = arith.constant 0 : index
    %c0_22 = arith.constant 0 : index
    %27 = vector.load %arg12[%c0_21, %c0_22] : memref<1x64xf32, #tpu.memory_space<vmem>>, vector<1x64xf32>
    %28 = arith.maximumf %27, %26 : vector<1x64xf32>
    %29 = arith.subf %27, %28 : vector<1x64xf32>
    %30 = math.exp %29 : vector<1x64xf32>
    %cst_23 = arith.constant -1.000000e+29 : f32
    %31 = vector.broadcast %cst_23 : f32 to vector<1x64xf32>
    %32 = arith.cmpf ogt, %28, %31 : vector<1x64xf32>
    %cst_24 = arith.constant 0.000000e+00 : f32
    %33 = vector.broadcast %cst_24 : f32 to vector<1x64xf32>
    %34 = arith.select %32, %28, %33 : vector<1x64xi1>, vector<1x64xf32>
    %35 = vector.broadcast %34 : vector<1x64xf32> to vector<256x64xf32>
    %36 = arith.subf %24, %35 : vector<256x64xf32>
    %37 = math.exp %36 : vector<256x64xf32>
    %38 = arith.truncf %37 : vector<256x64xf32> to vector<256x64xbf16>
    %c0_25 = arith.constant 0 : index
    %c0_26 = arith.constant 0 : index
    %39 = vector.load %arg13[%c0_25, %c0_26] : memref<1x64xf32, #tpu.memory_space<vmem>>, vector<1x64xf32>
    %40 = arith.mulf %39, %30 : vector<1x64xf32>
    %41 = arith.extf %38 : vector<256x64xbf16> to vector<256x64xf32>
    %cst_27 = arith.constant dense<0.000000e+00> : vector<64xf32>
    %42 = vector.multi_reduction <add>, %41, %cst_27 [0] : vector<256x64xf32> to vector<64xf32>
    %43 = vector.shape_cast %42 : vector<64xf32> to vector<1x64xf32>
    %44 = arith.addf %40, %43 : vector<1x64xf32>
    %c0_28 = arith.constant 0 : index
    %c0_29 = arith.constant 0 : index
    %45 = vector.load %arg13[%c0_28, %c0_29] : memref<1x64xf32, #tpu.memory_space<vmem>>, vector<1x64xf32>
    tpu.vector_store %arg13[%c0_28, %c0_29], %44 {strides = array<i32>} : memref<1x64xf32, #tpu.memory_space<vmem>>, vector<1x64xf32>,
    %cst_30 = arith.constant dense<0.000000e+00> : vector<256x128xf32>
    %46 = tpu.matmul %38, %6, %cst_30 {dimension_numbers = #tpu.dot_dimension_numbers<[1], [0], [0], [1], [0, 0, 1, 1], [], []>} : vector<256x64xbf16>, vector<64x128xbf16>, vector<256x128xf32> -> vector<256x128xf32>
    %47 = arith.mulf %46, %18 : vector<256x128xf32>
    %48 = arith.truncf %47 : vector<256x128xf32> to vector<256x128xbf16>
    %cst_31 = arith.constant dense<0.000000e+00> : vector<8x128xf32>
    %49 = tpu.matmul %4, %48, %cst_31 {dimension_numbers = #tpu.dot_dimension_numbers<[0], [0], [1], [1], [0, 1, 1, 1], [], []>} : vector<256x8xbf16>, vector<256x128xbf16>, vector<8x128xf32> -> vector<8x128xf32>
    %50 = arith.extf %5 : vector<8x64xbf16> to vector<8x64xf32>
    %51 = vector.broadcast %30 : vector<1x64xf32> to vector<8x64xf32>
    %52 = arith.mulf %50, %51 : vector<8x64xf32>
    %53 = arith.extf %6 : vector<64x128xbf16> to vector<64x128xf32>
    %cst_32 = arith.constant dense<0.000000e+00> : vector<8x128xf32>
    %54 = tpu.matmul %52, %53, %cst_32 {dimension_numbers = #tpu.dot_dimension_numbers<[1], [0], [0], [1], [0, 0, 1, 1], [], []>} : vector<8x64xf32>, vector<64x128xf32>, vector<8x128xf32> -> vector<8x128xf32>
    %c0_33 = arith.constant 0 : index
    %c0_34 = arith.constant 0 : index
    %55 = vector.load %arg14[%c0_33, %c0_34] : memref<8x128xf32, #tpu.memory_space<vmem>>, vector<8x128xf32>
    %56 = arith.mulf %55, %54 : vector<8x128xf32>
    %57 = arith.addf %56, %49 : vector<8x128xf32>
    %c0_35 = arith.constant 0 : index
    %c0_36 = arith.constant 0 : index
    %58 = vector.load %arg14[%c0_35, %c0_36] : memref<8x128xf32, #tpu.memory_space<vmem>>, vector<8x128xf32>
    tpu.vector_store %arg14[%c0_35, %c0_36], %57 {strides = array<i32>} : memref<8x128xf32, #tpu.memory_space<vmem>>, vector<8x128xf32>,
    %c0_37 = arith.constant 0 : index
    %c0_38 = arith.constant 0 : index
    %59 = vector.load %arg12[%c0_37, %c0_38] : memref<1x64xf32, #tpu.memory_space<vmem>>, vector<1x64xf32>
    tpu.vector_store %arg12[%c0_37, %c0_38], %28 {strides = array<i32>} : memref<1x64xf32, #tpu.memory_space<vmem>>, vector<1x64xf32>,
    %c1_i32 = arith.constant 1 : i32
    %60 = arith.cmpi eq, %arg1, %c1_i32 : i32
    %61 = arith.extui %60 : i1 to i32
    %c0_i32_39 = arith.constant 0 : i32
    %62 = arith.cmpi ne, %61, %c0_i32_39 : i32
    scf.if %62 {
      %c0_40 = arith.constant 0 : index
      %c0_41 = arith.constant 0 : index
      %63 = vector.load %arg12[%c0_40, %c0_41] : memref<1x64xf32, #tpu.memory_space<vmem>>, vector<1x64xf32>
      %c0_42 = arith.constant 0 : index
      %c0_43 = arith.constant 0 : index
      %c0_44 = arith.constant 0 : index
      %64 = vector.load %arg9[%c0_42, %c0_43, %c0_44] : memref<1x1x64xf32, #tpu.memory_space<vmem>>, vector<1x1x64xf32>
      %65 = vector.shape_cast %64 : vector<1x1x64xf32> to vector<1x64xf32>
      %66 = vector.shape_cast %63 : vector<1x64xf32> to vector<1x1x64xf32>
      tpu.vector_store %arg9[%c0_42, %c0_43, %c0_44], %66 {strides = array<i32>} : memref<1x1x64xf32, #tpu.memory_space<vmem>>, vector<1x1x64xf32>,
      %c0_45 = arith.constant 0 : index
      %c0_46 = arith.constant 0 : index
      %67 = vector.load %arg13[%c0_45, %c0_46] : memref<1x64xf32, #tpu.memory_space<vmem>>, vector<1x64xf32>
      %c0_47 = arith.constant 0 : index
      %c0_48 = arith.constant 0 : index
      %c0_49 = arith.constant 0 : index
      %68 = vector.load %arg10[%c0_47, %c0_48, %c0_49] : memref<1x1x64xf32, #tpu.memory_space<vmem>>, vector<1x1x64xf32>
      %69 = vector.shape_cast %68 : vector<1x1x64xf32> to vector<1x64xf32>
      %70 = vector.shape_cast %67 : vector<1x64xf32> to vector<1x1x64xf32>
      tpu.vector_store %arg10[%c0_47, %c0_48, %c0_49], %70 {strides = array<i32>} : memref<1x1x64xf32, #tpu.memory_space<vmem>>, vector<1x1x64xf32>,
      %c0_50 = arith.constant 0 : index
      %c0_51 = arith.constant 0 : index
      %71 = vector.load %arg14[%c0_50, %c0_51] : memref<8x128xf32, #tpu.memory_space<vmem>>, vector<8x128xf32>
      %c0_52 = arith.constant 0 : index
      %c0_53 = arith.constant 0 : index
      %c0_54 = arith.constant 0 : index
      %72 = vector.load %arg11[%c0_52, %c0_53, %c0_54] : memref<1x8x128xf32, #tpu.memory_space<vmem>>, vector<1x8x128xf32>
      %73 = vector.shape_cast %72 : vector<1x8x128xf32> to vector<8x128xf32>
      %74 = vector.shape_cast %71 : vector<8x128xf32> to vector<1x8x128xf32>
      tpu.vector_store %arg11[%c0_52, %c0_53, %c0_54], %74 {strides = array<i32>} : memref<1x8x128xf32, #tpu.memory_space<vmem>>, vector<1x8x128xf32>,
    } else {
    }
    return
  }
  func.func @transform_0(%arg0: i32, %arg1: i32) -> (i32, i32) {
    %c2_i32 = arith.constant 2 : i32
    %0 = arith.muli %arg0, %c2_i32 : i32
    %1 = arith.addi %0, %arg1 : i32
    %c0_i32 = arith.constant 0 : i32
    %c0_i32_0 = arith.constant 0 : i32
    return %1, %c0_i32 : i32, i32
  }
  func.func @transform_1(%arg0: i32, %arg1: i32) -> (i32, i32) {
    %c2_i32 = arith.constant 2 : i32
    %0 = arith.muli %arg0, %c2_i32 : i32
    %1 = arith.addi %0, %arg1 : i32
    %c0_i32 = arith.constant 0 : i32
    %c0_i32_0 = arith.constant 0 : i32
    return %1, %c0_i32 : i32, i32
  }
  func.func @transform_2(%arg0: i32, %arg1: i32) -> (i32, i32) {
    %c0_i32 = arith.constant 0 : i32
    %c0_i32_0 = arith.constant 0 : i32
    %c0_i32_1 = arith.constant 0 : i32
    return %c0_i32, %c0_i32_0 : i32, i32
  }
  func.func @transform_3(%arg0: i32, %arg1: i32) -> (i32, i32) {
    %c0_i32 = arith.constant 0 : i32
    %c0_i32_0 = arith.constant 0 : i32
    %c0_i32_1 = arith.constant 0 : i32
    return %c0_i32, %c0_i32_0 : i32, i32
  }
  func.func @transform_4(%arg0: i32, %arg1: i32) -> (i32, i32) {
    %c0_i32 = arith.constant 0 : i32
    %c0_i32_0 = arith.constant 0 : i32
    %c0_i32_1 = arith.constant 0 : i32
    return %c0_i32, %c0_i32_0 : i32, i32
  }
  func.func @transform_5(%arg0: i32, %arg1: i32) -> (i32, i32) {
    %c0_i32 = arith.constant 0 : i32
    %c0_i32_0 = arith.constant 0 : i32
    %c0_i32_1 = arith.constant 0 : i32
    return %c0_i32, %c0_i32_0 : i32, i32
  }
  func.func @transform_6(%arg0: i32, %arg1: i32) -> (i32, i32) {
    %c0_i32 = arith.constant 0 : i32
    %c0_i32_0 = arith.constant 0 : i32
    %c0_i32_1 = arith.constant 0 : i32
    return %c0_i32, %c0_i32_0 : i32, i32
  }
  func.func @transform_7(%arg0: i32, %arg1: i32) -> (i32, i32, i32) {
    %c0_i32 = arith.constant 0 : i32
    %c0_i32_0 = arith.constant 0 : i32
    %c0_i32_1 = arith.constant 0 : i32
    return %arg0, %c0_i32, %c0_i32_0 : i32, i32, i32
  }
  func.func @transform_8(%arg0: i32, %arg1: i32) -> (i32, i32, i32) {
    %c0_i32 = arith.constant 0 : i32
    %c0_i32_0 = arith.constant 0 : i32
    %c0_i32_1 = arith.constant 0 : i32
    return %arg0, %c0_i32, %c0_i32_0 : i32, i32, i32
  }
  func.func @transform_9(%arg0: i32, %arg1: i32) -> (i32, i32, i32) {
    %c0_i32 = arith.constant 0 : i32
    %c0_i32_0 = arith.constant 0 : i32
    %c0_i32_1 = arith.constant 0 : i32
    return %arg0, %c0_i32, %c0_i32_0 : i32, i32, i32
  }
}

</mosaic_0001>

<bundles_post_ra>
// kernel: tpu_custom_call.1
= control target key start
LH: loop header
LB: loop body
LE: loop exit
PB: predicated region body
PF: predicated region fallthrough
CT: control target
= control target key end

     0   :  { %15 = vsyncpa [#allocation6], 0  ;;  %s4826_s0 = inlined_call_operand.vmem [shape: bf16[1024,128], index: 0, kind: input, shape index: {}]   ;;  %s4827_s1 = inlined_call_operand.vmem [shape: bf16[1024,8], index: 1, kind: input, shape index: {}]   ;;  %s4828_s2 = inlined_call_operand.vmem [shape: bf16[128,256], index: 2, kind: input, shape index: {}]   ;;  %s4829_s3 = inlined_call_operand.vmem [shape: bf16[128,64], index: 3, kind: input, shape index: {}]   ;;  %s4830_s4 = inlined_call_operand.hbm [shape: bf16[128,128], index: 4, kind: input, shape index: {}]   ;;  %s4831_s5 = inlined_call_operand.vmem [shape: bf16[8,64], index: 5, kind: input, shape index: {}]   ;;  %s4832_s6 = inlined_call_operand.hbm [shape: bf16[64,128], index: 6, kind: input, shape index: {}]   ;;  %s4833_s7 = inlined_call_operand.hbm [shape: f32[2,1,64], index: 7, kind: output, shape index: {0}]   ;;  %s4834_s8 = inlined_call_operand.hbm [shape: f32[2,1,64], index: 8, kind: output, shape index: {1}]   ;;  %s4835_s9 = inlined_call_operand.hbm [shape: f32[2,8,128], index: 9, kind: output, shape index: {2}]  }
   0x1   :  { %16 = vsyncpa [#allocation9], 0 }
   0x2   :  { %17 = vsyncpa [#allocation7], 0 }
   0x3   :  { %19 = vsyncpa [#allocation7 + $0x1], 0 }
   0x4   :  { %20 = vsyncpa [#allocation12], 0 }
   0x5   :  { %22 = vsyncpa [#allocation12 + $0x1], 0  ;;  %s3810_s30 = smov 0   ;;  %s3812_s10 = smov 0  }
   0x6   :  { %s3814_s11 = smov 0   ;;  %s3816_s12 = smov 0  }
   0x7   :  { %s3818_s13 = smov 0   ;;  %s3820_s14 = smov 0  }
   0x8   :  { %s3822_s15 = smov 0   ;;  %s3824_s16 = smov 0  }
   0x9 LB: > { %4850 = sst [smem:[#allocation18_spill]] %s3717_s30  ;;  %s3851_s17 = sadd.s32 4294967295, %s3745_s16   ;;  %s3745_s16 = sphi %s3824_s16, %s28_s16   ;;  %s3741_s15 = sphi %s3822_s15, %s4935_s15   ;;  %s3737_s14 = sphi %s3820_s14, %s4934_s14   ;;  %s3733_s13 = sphi %s3818_s13, %s4933_s13   ;;  %s3729_s12 = sphi %s3816_s12, %s4932_s12   ;;  %s3725_s11 = sphi %s3814_s11, %s4931_s11   ;;  %s3721_s10 = sphi %s3812_s10, %s4937_s10   ;;  %s3717_s30 = sphi %s3810_s30, %s4936_s30  }
   0xa   : > { %4851 = sst [smem:[#allocation19_spill]] %s3725_s11  ;;  %s4836_s18 = sadd.s32 4294967294, %s3745_s16  }
   0xb   : > { %4852 = sst [smem:[#allocation20_spill]] %s3737_s14  ;;  %s37_s19 = sadd.s32 1, %s3737_s14 }
   0xc   : > { %4853 = sst [smem:[#allocation21_spill]] %s3741_s15  ;;  %s40_s20 = sadd.s32 1, %s3741_s15 }
   0xd   : > { %4854 = sst [smem:[#allocation22_spill]] %s3745_s16  ;;  %p38_p0 = scmp.ge.s32.totalorder %s37_s19, 2 }
   0xe   : > { %s212_s21 = sadd.s32 1, %s3725_s11  ;;  %p222_p1 = scmp.ne.s32.totalorder %s3725_s11, %s3721_s10 }
   0xf   : > { %p223_p2 = scmp.eq.s32.totalorder %s3851_s17, 3  ;;  %s4939_s19 = smov (%p38_p0, %s37_s19), 0 }
  0x10   : > { %4855 = sst [smem:[#allocation23_spill]] %s4939_s19  ;;  %s4941_s20 = smov (!%p38_p0, %s40_s20), %s3741_s15 }
  0x11   : > { %p3863_p3 = por %p223_p2, %p222_p1  ;;  %p228_p4 = scmp.ne.s32.totalorder %s3721_s10, %s3717_s30 }
  0x12   : > { %p42_p5 = scmp.ge.s32.totalorder %s4941_s20, 2  ;;  %p229_p6 = scmp.eq.s32.totalorder %s4836_s18, 3 }
  0x13   : > { %s4856_s22 = scalar_select %p3863_p3, 1, 0 }
  0x14   : > { %p2797_p7 = scmp.ge.s32.totalorder %s3745_s16, 1  ;;  %p288_p8 = scmp.lt.s32.totalorder %s3745_s16, 5 }
  0x15   : > { %s4943_s20 = smov (%p42_p5, %s4941_s20), 0  ;;  %p3875_p9 = por %p229_p6, %p228_p4 }
  0x16   : > { %4857 = sst [smem:[#allocation24_spill]] %s4943_s20  ;;  %p3879_p10 = pnand %p2797_p7, %p288_p8 }
  0x17   : > { %s4858_s23 = scalar_select %p3875_p9, 1, 0 }
  0x18   : > { %s4860_s24 = scalar_select %p3879_p10, 1, 0 }
  0x19   : > { %4859 = sst [smem:[#allocation25_spill]] %s4858_s23  ;;  %s209_s25 = ssub.s32 %s3741_s15, %s4943_s20 }
  0x1a   : > { %p210_p11 = scmp.eq.s32.totalorder %s209_s25, 0  ;;  %p3288_p12 = pneg %p3879_p10 }
  0x1b   : > { %p4840_p13 = scmp.eq.s32.totalorder %s3851_s17, 0  ;;  %s3747_s27 = smov [#allocation5]  }
  0x1c   : > { %s3889_s26 = scalar_select %p210_p11, %s3725_s11, %s212_s21  }
  0x1d   : > { %s306_s28 = sshll.u32 %s3747_s27, 4  ;;  %p3893_p0 = pnand %p4840_p13, %p3288_p12  ;;  %s307_s28 = int_to_ptr.vmem [resolvable:$true] %s306_s28 }
  0x1e   : > { %4861 = sst [smem:[#allocation26_spill]] %s3889_s26  ;;  %s3527_s20 = scalar_lea.hbm %s4830_s4, 1024 }
  0x1f   : > { %p3528_p1 = scmp.ne.s32.totalorder %s4830_s4, %s3527_s20  ;;  %p3529_p2 = pneg %p3893_p0 }
  0x20   : > { %p3534_p6 = scmp.lt.u32.totalorder %s3527_s20, %s4830_s4 }
  0x21   : > { %p3530_p4 = pnand %p3529_p2, %p3528_p1 }
  0x23   : > { %p3531_p5 = pneg %p3530_p4 }
  0x25   : > { %p3536_p7 = pnand %p3534_p6, %p3531_p5 }
  0x27   : > { %3539 = shalt.err (!%p3536_p7)
}
  0x28   : > { %s3540_s14 = scalar_lea.vmem %s307_s28, 1024  ;;  %p3548_p13 = scmp.lt.s32.totalorder %s307_s28, %s307_s28 }
  0x29   : > { %p3541_p8 = scmp.ne.s32.totalorder %s307_s28, %s3540_s14  ;;  %p3549_p9 = scmp.lt.s32.totalorder %s3540_s14, %s3540_s14 }
  0x2b   : > { %p3543_p11 = pnand %p3541_p8, %p3529_p2  ;;  %p3550_p3 = por %p3549_p9, %p3548_p13 }
  0x2d   : > { %p3544_p12 = pneg %p3543_p11 }
  0x2f   : > { %p3551_p10 = pnand %p3550_p3, %p3544_p12 }
  0x31   : > { %3554 = shalt.err (!%p3551_p10)
}
  0x32   : > { %s3748_s15 = smov 64   ;;  %s3749_s18 = smov 4  }
  0x33   : > { %3291 = dma.hbm_to_vmem [thread:$0]  (!%p3893_p0), %s4830_s4, 1024, %s307_s28, [#allocation6], %s3748_s15, %s3748_s15, %s3749_s18  }
  0x34   : > { %s3750_s25 = smov [#allocation8]   ;;  %s3555_s11 = scalar_lea.hbm %s4832_s6, 512 }
  0x35   : > { %s322_s21 = sshll.u32 %s3750_s25, 4  ;;  %p3556_p3 = scmp.ne.s32.totalorder %s4832_s6, %s3555_s11  ;;  %s323_s21 = int_to_ptr.vmem [resolvable:$true] %s322_s21 }
  0x36   : > { %p3562_p13 = scmp.lt.u32.totalorder %s3555_s11, %s4832_s6 }
  0x37   : > { %p3558_p9 = pnand %p3556_p3, %p3529_p2 }
  0x39   : > { %p3559_p10 = pneg %p3558_p9 }
  0x3b   : > { %p3564_p1 = pnand %p3562_p13, %p3559_p10 }
  0x3d   : > { %3567 = shalt.err (!%p3564_p1)
}
  0x3e   : > { %s3568_s28 = scalar_lea.vmem %s323_s21, 512  ;;  %p3576_p7 = scmp.lt.s32.totalorder %s323_s21, %s323_s21 }
  0x3f   : > { %p3569_p4 = scmp.ne.s32.totalorder %s323_s21, %s3568_s28  ;;  %p3577_p8 = scmp.lt.s32.totalorder %s3568_s28, %s3568_s28 }
  0x41   : > { %p3571_p5 = pnand %p3569_p4, %p3529_p2  ;;  %p3578_p11 = por %p3577_p8, %p3576_p7 }
  0x43   : > { %p3572_p6 = pneg %p3571_p5 }
  0x45   : > { %p3579_p12 = pnand %p3578_p11, %p3572_p6 }
  0x47   : > { %3582 = shalt.err (!%p3579_p12)
}
  0x48   : > { %3294 = dma.hbm_to_vmem [thread:$0]  (!%p3893_p0), %s4832_s6, 512, %s323_s21, [#allocation9], %s3748_s15, %s3748_s15, %s3749_s18  }
  0x49   : > { %p4863_p3 = scmp.ne.s32.totalorder %s4860_s24, 0 }
  0x4b   : > { %364 = sbr.rel (%p4863_p3) target bundleno = 1391 (0x56f), region = 48 }
  0x52   : > { %p4864_p9 = scmp.eq.s32.totalorder %s3851_s17, 0 }
  0x54   : > { %3700 = dma.done.wait (%p4864_p9), [#allocation6], 1024   ;;  %p4865_p2 = pmov %p4864_p9 }
  0x56   : > { %3702 = vsyncadd (%p4865_p2), [#allocation6], 4294966272  ;;  %p4866_p10 = pmov %p4865_p2 }
  0x57   : > { %p4867_p13 = pmov %p4865_p2 }
  0x58   : > { %3704 = dma.done.wait (%p4866_p10), [#allocation9], 512  }
  0x59   : > { %3706 = vsyncadd (%p4867_p13), [#allocation9], 4294966784  ;;  %s3950_s30 = sand.u32 1, %s3721_s10   ;;  %s2805_s11 = sshll.u32 %s3733_s13, 1 }
  0x5a   : > { %s2804_s16 = sshll.u32 %s3950_s30, 3  ;;  %s422_s24 = sadd.s32 %s3729_s12, %s2805_s11 }
  0x5b   : > { %s2806_s29 = sshll.u32 %s422_s24, 5  ;;  %s407_s14 = scalar_lea.vmem [#allocation10], %s3950_s30 }
  0x5c   : > { %p424_p0 = scmp.lt.s32.totalorder %s2806_s29, 127  ;;  %s413_s28 = scalar_lea.vmem [#allocation11], %s3950_s30 }
  0x5d   : > { %s3967_s23 = scalar_lea.vmem [#allocation13], %s2804_s16  ;;  %p2811_p1 = scmp.ne.s32.totalorder %s3729_s12, 0 }
  0x5e   : > { %s4945_s29 = smov (!%p424_p0, %s2806_s29), 127  ;;  %vm446_vm0 = vcmask (!%p2811_p1), 516096   ;;  %v3751_v0 = vmov (!%p2811_p1), -1e+30   ;;  %v3752_v1 = vmov (!%p2811_p1), 0.0  }
  0x5f   : > { %s2807_s15 = sshll.u32 %s4945_s29, 2  ;;  %445 = sbr.rel (%p2811_p1) target bundleno = 102 (0x66), region = 60  ;;  %447 = vst.msk [vmem:[#allocation2] sm:$0x1] (!%p2811_p1), %vm446_vm0, %v3751_v0  ;;  %448 = vst.msk [vmem:[#allocation3] sm:$0x1] (!%p2811_p1), %vm446_vm0, %v3752_v1 }
  0x60   : > { %s3958_s20 = scalar_lea.vmem %s4826_s0, %s2807_s15  ;;  %s3963_s27 = scalar_lea.vmem %s4827_s1, %s2807_s15  ;;  %449 = vst [vmem:[#allocation4] sm:$0xff] (!%p2811_p1), %v3752_v1 }
  0x66 PF: > { %v3384_v2 = vld [vmem:[%s4828_s2 + $0x4] ss:$8 sps:$4 sm:$0xff]   ;;  %v3386_v3 = vld [vmem:[%s4828_s2] ss:$8 sps:$4 sm:$0xff]   ;;  %v3753_v4 = vmov 0   ;;  %v3427_v22 = vld [vmem:[#allocation5 + $0x8] sm:$0xff]  }
  0x67   : > { %747 = vmatprep.mubr.bf16.mxu0 %v3753_v4  ;;  %715 = vmatprep.subr.bf16.mxu0 %v3384_v2  ;;  %v3387_v5 = vld [vmem:[%s4828_s2 + $0x14] ss:$8 sps:$4 sm:$0xff]   ;;  %v3389_v6 = vld [vmem:[%s4828_s2 + $0x10] ss:$8 sps:$4 sm:$0xff]   ;;  %v3390_v7 = vld [vmem:[%s4828_s2 + $0x24] ss:$8 sps:$4 sm:$0xff]  }
  0x68   : > { %716 = vmatpush1.bf16.msra.mxu0 %v3386_v3  ;;  %v3392_v8 = vld [vmem:[%s4828_s2 + $0x20] ss:$8 sps:$4 sm:$0xff]   ;;  %v3393_v9 = vld [vmem:[%s4828_s2 + $0x34] ss:$8 sps:$4 sm:$0xff]   ;;  %v3395_v10 = vld [vmem:[%s4828_s2 + $0x30] ss:$8 sps:$4 sm:$0xff]  }
  0x69   : > { %717 = vmatprep.subr.bf16.mxu0 %v3387_v5  ;;  %v3396_v11 = vld [vmem:[%s4828_s2 + $0x44] ss:$8 sps:$4 sm:$0xff]   ;;  %v3398_v12 = vld [vmem:[%s4828_s2 + $0x40] ss:$8 sps:$4 sm:$0xff]   ;;  %v3399_v13 = vld [vmem:[%s4828_s2 + $0x54] ss:$8 sps:$4 sm:$0xff]  }
  0x6a   : > { %v3401_v14 = vld [vmem:[%s4828_s2 + $0x50] ss:$8 sps:$4 sm:$0xff]   ;;  %v3402_v15 = vld [vmem:[%s4828_s2 + $0x64] ss:$8 sps:$4 sm:$0xff]   ;;  %v3404_v16 = vld [vmem:[%s4828_s2 + $0x60] ss:$8 sps:$4 sm:$0xff]  }
  0x6b   : > { %v3405_v17 = vld [vmem:[%s4828_s2 + $0x74] ss:$8 sps:$4 sm:$0xff]   ;;  %v3407_v18 = vld [vmem:[%s4828_s2 + $0x70] ss:$8 sps:$4 sm:$0xff]   ;;  %v3424_v19 = vld [vmem:[%s4829_s3] sm:$0xff]   ;;  %vm1374_vm1 = vcmask 1043456  }
  0x6c   : > { %718 = vmatpush1.bf16.msra.mxu0 %v3389_v6  ;;  %v3425_v20 = vld [vmem:[#allocation5] sm:$0xff]   ;;  %v3408_v21 = vld [vmem:[%s3958_s20] sm:$0xff]   ;;  %v3430_v28 = vld [vmem:[%s4829_s3 + $0x18] sm:$0xff]   ;;  %vm1325_vm2 = vcmask 64512   ;;  %vm1812_vm3 = vcmask 523264   ;;  %vm2111_vm4 = vcmask 516096  }
  0x6d   : > { %719 = vmatprep.subr.bf16.mxu0 %v3390_v7  ;;  %3068 = vmatprep.subr.bf16.mxu1 %v3425_v20  ;;  %v3426_v23 = vld [vmem:[%s4829_s3 + $0x8] sm:$0xff]   ;;  %v3429_v24 = vld [vmem:[#allocation5 + $0x10] sm:$0xff]   ;;  %v3428_v25 = vld [vmem:[%s4829_s3 + $0x10] sm:$0xff]   ;;  %vm3755_vm6 = vmmov 0   ;;  %p2945_p4 = scmp.ne.s32.totalorder %s3729_s12, 1 }
  0x6e   : > { %3069 = vmatpush3.bf16.msra.mxu1 %v3425_v20  ;;  %v3431_v26 = vld [vmem:[#allocation5 + $0x18] sm:$0xff]   ;;  %v3410_v30 = vld [vmem:[%s3958_s20 + $0x10] sm:$0xff]   ;;  %v3411_v31 = vld [vmem:[%s3958_s20 + $0x18] sm:$0xff]  }
  0x6f   : > { %3070 = vmatprep.subr.bf16.mxu1 %v3427_v22  ;;  %v3409_v27 = vld [vmem:[%s3958_s20 + $0x8] sm:$0xff]   ;;  %v3432_v29 = vld [vmem:[%s4829_s3 + $0x20] sm:$0xff]   ;;  %v3414_v34 = vld [vmem:[%s3958_s20 + $0x30] sm:$0xff]  }
  0x70   : > { %720 = vmatpush1.bf16.msra.mxu0 %v3392_v8  ;;  %v3412_v32 = vld [vmem:[%s3958_s20 + $0x20] sm:$0xff]   ;;  %v3413_v33 = vld [vmem:[%s3958_s20 + $0x28] sm:$0xff]   ;;  %v3415_v35 = vld [vmem:[%s3958_s20 + $0x38] sm:$0xff]  }
  0x71   : > { %721 = vmatprep.subr.bf16.mxu0 %v3393_v9  ;;  %v3416_v36 = vld [vmem:[%s3958_s20 + $0x40] sm:$0xff]   ;;  %v3417_v37 = vld [vmem:[%s3958_s20 + $0x48] sm:$0xff]   ;;  %v3418_v38 = vld [vmem:[%s3958_s20 + $0x50] sm:$0xff]  }
  0x72   : > { %3071 = vmatpush3.bf16.msra.mxu1 %v3427_v22  ;;  %v3433_v39 = vld [vmem:[#allocation5 + $0x20] sm:$0xff]   ;;  %v3419_v40 = vld [vmem:[%s3958_s20 + $0x58] sm:$0xff]   ;;  %v3420_v45 = vld [vmem:[%s3958_s20 + $0x60] sm:$0xff]  }
  0x73   : > { %3072 = vmatprep.subr.bf16.mxu1 %v3429_v24  ;;  %v3434_v41 = vld [vmem:[%s4829_s3 + $0x28] sm:$0xff]   ;;  %v3435_v42 = vld [vmem:[#allocation5 + $0x28] sm:$0xff]   ;;  %v3437_v44 = vld [vmem:[#allocation5 + $0x30] sm:$0xff]  }
  0x74   : > { %722 = vmatpush1.bf16.msra.mxu0 %v3395_v10  ;;  %v3436_v43 = vld [vmem:[%s4829_s3 + $0x30] sm:$0xff]   ;;  %v3438_v46 = vld [vmem:[%s4829_s3 + $0x38] sm:$0xff]   ;;  %v3439_v47 = vld [vmem:[#allocation5 + $0x38] sm:$0xff]  }
  0x75   : > { %723 = vmatprep.subr.bf16.mxu0 %v3396_v11  ;;  %v3421_v48 = vld [vmem:[%s3958_s20 + $0x68] sm:$0xff]   ;;  %v3422_v49 = vld [vmem:[%s3958_s20 + $0x70] sm:$0xff]   ;;  %v3423_v50 = vld [vmem:[%s3958_s20 + $0x78] sm:$0xff]  }
  0x76   : > { %3073 = vmatpush3.bf16.msra.mxu1 %v3429_v24  ;;  %v514_v51 = vld [vmem:[%s4831_s5] sm:$0xf]  ;;  %v4083_v61 = vld [vmem:[%s3963_s27 + $0x8] sm:$0xff]   ;;  %v4087_v1 = vld [vmem:[%s3963_s27 + $0x10] sm:$0xff]  }
  0x77   : > { %3074 = vmatprep.subr.bf16.mxu1 %v3431_v26  ;;  %v4079_v53 = vld [vmem:[%s3963_s27] sm:$0xff]   ;;  %v4091_v9 = vld [vmem:[%s3963_s27 + $0x18] sm:$0xff]   ;;  %v4100_v22 = vld [vmem:[%s3963_s27 + $0x28] sm:$0xff]  }
  0x78   : > { %724 = vmatpush1.bf16.msra.mxu0 %v3398_v12  ;;  %2410 = vxpose.xlu1.c.b16.start [1/8] (narrow) %v4079_v53, 16  ;;  %v1376_v12 = vsel %vm1374_vm1, %v514_v51, 0 }
  0x79   : > { %725 = vmatprep.subr.bf16.mxu0 %v3399_v13 }
  0x7a   : > { %3075 = vmatpush3.bf16.msra.mxu1 %v3431_v26  ;;  %v4104_v26 = vld [vmem:[%s3963_s27 + $0x30] sm:$0xff]  }
  0x7b   : > { %3076 = vmatprep.subr.bf16.mxu1 %v3433_v39 }
  0x7c   : > { %726 = vmatpush1.bf16.msra.mxu0 %v3401_v14  ;;  %2411 = vxpose.xlu1.c.b16.cont [2/8] (narrow) %v4083_v61, 16  ;;  %v4096_v14 = vld [vmem:[%s3963_s27 + $0x20] sm:$0xff]  }
  0x7d   : > { %727 = vmatprep.subr.bf16.mxu0 %v3402_v15 }
  0x7e   : > { %3077 = vmatpush3.bf16.msra.mxu1 %v3433_v39 }
  0x7f   : > { %3078 = vmatprep.subr.bf16.mxu1 %v3435_v42 }
  0x80   : > { %728 = vmatpush1.bf16.msra.mxu0 %v3404_v16  ;;  %2412 = vxpose.xlu1.c.b16.cont [3/8] (narrow) %v4087_v1, 16 }
  0x81   : > { %729 = vmatprep.subr.bf16.mxu0 %v3405_v17 }
  0x82   : > { %3079 = vmatpush3.bf16.msra.mxu1 %v3435_v42 }
  0x83   : > { %3080 = vmatprep.subr.bf16.mxu1 %v3437_v44 }
  0x84   : > { %730 = vmatpush1.bf16.msra.mxu0 %v3407_v18  ;;  %2413 = vxpose.xlu1.c.b16.cont [4/8] (narrow) %v4091_v9, 16 }
  0x85   : > { %3150 = vmatprep.subr.bf16.mxu0 %v3424_v19 }
  0x86   : > { %3081 = vmatpush3.bf16.msra.mxu1 %v3437_v44 }
  0x87   : > { %748 = vmatmul.mubr.bf16.vlgmr.msra.gmra.mrb[0].mxu0 %v3408_v21  ;;  %3082 = vmatprep.subr.bf16.mxu1 %v3439_v47 }
  0x88   : > { %757 = vmatprep.mubr.bf16.mxu0 %v3753_v4  ;;  %3151 = vmatpush3.bf16.msra.mxu0 %v3424_v19 }
  0x89   : > { %3152 = vmatprep.subr.bf16.mxu0 %v3426_v23  ;;  %2414 = vxpose.xlu1.c.b16.cont [5/8] (narrow) %v4096_v14, 16 }
  0x8a   : > { %3083 = vmatpush3.bf16.msra.mxu1 %v3439_v47 }
  0x8b   : > { %3269 = vmatprep.subr.msk.bf16.mxu1 %vm1374_vm1, %v514_v51 }
  0x8c   : > { %3153 = vmatpush3.bf16.msra.mxu0 %v3426_v23 }
  0x8d   : > { %3154 = vmatprep.subr.bf16.mxu0 %v3428_v25  ;;  %2415 = vxpose.xlu1.c.b16.cont [6/8] (narrow) %v4100_v22, 16 }
  0x8f   : > { %758 = vmatmul.mubr.bf16.gmra.mrb[4].mxu0 %v3409_v27 }
  0x90   : > { %767 = vmatprep.mubr.bf16.mxu0 %v3753_v4  ;;  %3155 = vmatpush3.bf16.msra.mxu0 %v3428_v25 }
  0x91   : > { %3156 = vmatprep.subr.bf16.mxu0 %v3430_v28  ;;  %2416 = vxpose.xlu1.c.b16.cont [7/8] (narrow) %v4104_v26, 16 }
  0x94   : > { %3157 = vmatpush3.bf16.msra.mxu0 %v3430_v28 }
  0x95   : > { %3158 = vmatprep.subr.bf16.mxu0 %v3432_v29 }
  0x97   : > { %768 = vmatmul.mubr.bf16.gmra.mrb[8].mxu0 %v3410_v30 }
  0x98   : > { %777 = vmatprep.mubr.bf16.mxu0 %v3753_v4  ;;  %3159 = vmatpush3.bf16.msra.mxu0 %v3432_v29 }
  0x99   : > { %3160 = vmatprep.subr.bf16.mxu0 %v3434_v41 }
  0x9c   : > { %3161 = vmatpush3.bf16.msra.mxu0 %v3434_v41 }
  0x9d   : > { %3162 = vmatprep.subr.bf16.mxu0 %v3436_v43 }
  0x9f   : > { %778 = vmatmul.mubr.bf16.gmra.mrb[12].mxu0 %v3411_v31 }
  0xa0   : > { %787 = vmatprep.mubr.bf16.mxu0 %v3753_v4  ;;  %3163 = vmatpush3.bf16.msra.mxu0 %v3436_v43 }
  0xa1   : > { %3164 = vmatprep.subr.bf16.mxu0 %v3438_v46 }
  0xa4   : > { %3165 = vmatpush3.bf16.msra.mxu0 %v3438_v46  ;;  %v4116_v46 = vld [vmem:[%s3963_s27 + $0x48] sm:$0xff]  }
  0xa7   : > { %788 = vmatmul.mubr.bf16.gmra.mrb[16].mxu0 %v3412_v32 }
  0xa8   : > { %797 = vmatprep.mubr.bf16.mxu0 %v3753_v4 }
  0xaf   : > { %798 = vmatmul.mubr.bf16.gmra.mrb[20].mxu0 %v3413_v33 }
  0xb0   : > { %807 = vmatprep.mubr.bf16.mxu0 %v3753_v4 }
  0xb7   : > { %808 = vmatmul.mubr.bf16.gmra.mrb[24].mxu0 %v3414_v34  ;;  %v4108_v34 = vld [vmem:[%s3963_s27 + $0x38] sm:$0xff]  }
  0xb8   : > { %817 = vmatprep.mubr.bf16.mxu0 %v3753_v4  ;;  %2417 = vxpose.xlu1.c.b16.end [8/8] (narrow) %v4108_v34, 16 }
  0xbf   : > { %818 = vmatmul.mubr.bf16.gmra.mrb[28].mxu0 %v3415_v35 }
  0xc0   : > { %827 = vmatprep.mubr.bf16.mxu0 %v3753_v4 }
  0xc7   : > { %828 = vmatmul.mubr.bf16.gmra.mrb[32].mxu0 %v3416_v36 }
  0xc8   : > { %837 = vmatprep.mubr.bf16.mxu0 %v3753_v4 }
  0xcf   : > { %838 = vmatmul.mubr.bf16.gmra.mrb[36].mxu0 %v3417_v37 }
  0xd0   : > { %847 = vmatprep.mubr.bf16.mxu0 %v3753_v4 }
  0xd7   : > { %848 = vmatmul.mubr.bf16.gmra.mrb[40].mxu0 %v3418_v38  ;;  %v4112_v38 = vld [vmem:[%s3963_s27 + $0x40] sm:$0xff]  }
  0xd8   : > { %857 = vmatprep.mubr.bf16.mxu0 %v3753_v4  ;;  %2426 = vxpose.xlu0.c.b16.start [1/8] (narrow) %v4112_v38, 16 }
  0xdc   : > { %2427 = vxpose.xlu0.c.b16.cont [2/8] (narrow) %v4116_v46, 16 }
  0xdf   : > { %858 = vmatmul.mubr.bf16.gmra.mrb[44].mxu0 %v3419_v40 }
  0xe0   : > { %867 = vmatprep.mubr.bf16.mxu0 %v3753_v4 }
  0xe7   : > { %868 = vmatmul.mubr.bf16.gmra.mrb[48].mxu0 %v3420_v45 }
  0xe8   : > { %877 = vmatprep.mubr.bf16.mxu0 %v3753_v4 }
  0xef   : > { %878 = vmatmul.mubr.bf16.gmra.mrb[52].mxu0 %v3421_v48 }
  0xf0   : > { %887 = vmatprep.mubr.bf16.mxu0 %v3753_v4 }
  0xf7   : > { %888 = vmatmul.mubr.bf16.gmra.mrb[56].mxu0 %v3422_v49 }
  0xf8   : > { %897 = vmatprep.mubr.bf16.mxu0 %v3753_v4 }
  0xff   : > { %898 = vmatmul.mubr.bf16.gmra.mrb[60].mxu0 %v3423_v50  ;;  %v4120_v50 = vld [vmem:[%s3963_s27 + $0x50] sm:$0xff]  }
 0x100   : > { %2428 = vxpose.xlu0.c.b16.cont [3/8] (narrow) %v4120_v50, 16 }
 0x15a   : > { %v749_v52 = vpop.f32.mrb[0].mxu0 }
 0x15b   : > { %v751_v54 = vpop.f32.mrb[1].mxu0  ;;  %v908_v56 = vmax.f32 %v749_v52, 0.0 }
 0x15c   : > { %v753_v55 = vpop.f32.mrb[2].mxu0  ;;  %v909_v59 = vmax.f32 %v751_v54, 0.0 }
 0x15d   : > { %v910_v57 = vmax.f32 %v753_v55, 0.0  ;;  %v755_v58 = vpop.f32.mrb[3].mxu0 }
 0x15e   : > { %v911_v60 = vmax.f32 %v755_v58, 0.0 }
 0x15f   : > { %v972_v62 = vpack.c.bf16 %v910_v57, %v908_v56 }
 0x160   : > { %v988_v63 = vpack.c.bf16 %v911_v60, %v909_v59  ;;  %v4124_v59 = vld [vmem:[%s3963_s27 + $0x58] sm:$0xff]  }
 0x161   : > { %3166 = vmatprep.mubr.bf16.mxu0 %v972_v62  ;;  %2429 = vxpose.xlu0.c.b16.cont [4/8] (narrow) %v4124_v59, 16 }
 0x162   : > { %v759_v0 = vpop.f32.mrb[4].mxu0  ;;  %3084 = vmatprep.mubr.bf16.mxu1 %v988_v63 }
 0x163   : > { %v761_v2 = vpop.f32.mrb[5].mxu0  ;;  %v912_v4 = vmax.f32 %v759_v0, 0.0  ;;  %v4128_v0 = vld [vmem:[%s3963_s27 + $0x60] sm:$0xff]  }
 0x164   : > { %v763_v3 = vpop.f32.mrb[6].mxu0  ;;  %v913_v7 = vmax.f32 %v761_v2, 0.0 }
 0x165   : > { %v914_v5 = vmax.f32 %v763_v3, 0.0  ;;  %v765_v6 = vpop.f32.mrb[7].mxu0  ;;  %2430 = vxpose.xlu0.c.b16.cont [5/8] (narrow) %v4128_v0, 16 }
 0x166   : > { %v915_v8 = vmax.f32 %v765_v6, 0.0 }
 0x167   : > { %v973_v10 = vpack.c.bf16 %v914_v5, %v912_v4 }
 0x168   : > { %v989_v11 = vpack.c.bf16 %v915_v8, %v913_v7 }
 0x169   : > { %3167 = vmatmul.mubr.bf16.vlgmr.msra.gmra.mrb[64].mxu0 %v973_v10  ;;  %v4132_v10 = vld [vmem:[%s3963_s27 + $0x68] sm:$0xff]  }
 0x16a   : > { %v769_v13 = vpop.f32.mrb[8].mxu0  ;;  %3085 = vmatmul.mubr.bf16.vlgmr.msra.gmra.mrb[0].mxu1 %v989_v11  ;;  %2431 = vxpose.xlu0.c.b16.cont [6/8] (narrow) %v4132_v10, 16 }
 0x16b   : > { %v771_v15 = vpop.f32.mrb[9].mxu0  ;;  %3117 = vmatpush3.bf16.msra.mxu1 %v1376_v12  ;;  %v916_v17 = vmax.f32 %v769_v13, 0.0 }
 0x16c   : > { %v773_v16 = vpop.f32.mrb[10].mxu0  ;;  %v917_v20 = vmax.f32 %v771_v15, 0.0  ;;  %v4136_v15 = vld [vmem:[%s3963_s27 + $0x70] sm:$0xff]  }
 0x16d   : > { %v918_v18 = vmax.f32 %v773_v16, 0.0  ;;  %v775_v19 = vpop.f32.mrb[11].mxu0 }
 0x16e   : > { %v919_v21 = vmax.f32 %v775_v19, 0.0  ;;  %2432 = vxpose.xlu0.c.b16.cont [7/8] (narrow) %v4136_v15, 16 }
 0x16f   : > { %v974_v23 = vpack.c.bf16 %v918_v18, %v916_v17 }
 0x170   : > { %v990_v24 = vpack.c.bf16 %v919_v21, %v917_v20 }
 0x171   : > { %3170 = vmatprep.mubr.bf16.mxu0 %v974_v23 }
 0x172   : > { %v779_v25 = vpop.f32.mrb[12].mxu0  ;;  %3088 = vmatprep.mubr.bf16.mxu1 %v990_v24  ;;  %v4140_v24 = vld [vmem:[%s3963_s27 + $0x78] sm:$0xff]  }
 0x173   : > { %v781_v27 = vpop.f32.mrb[13].mxu0  ;;  %v920_v29 = vmax.f32 %v779_v25, 0.0  ;;  %2433 = vxpose.xlu0.c.b16.end [8/8] (narrow) %v4140_v24, 16 }
 0x174   : > { %v783_v28 = vpop.f32.mrb[14].mxu0  ;;  %v921_v32 = vmax.f32 %v781_v27, 0.0 }
 0x175   : > { %v922_v30 = vmax.f32 %v783_v28, 0.0  ;;  %v785_v31 = vpop.f32.mrb[15].mxu0 }
 0x176   : > { %v923_v33 = vmax.f32 %v785_v31, 0.0 }
 0x177   : > { %v975_v35 = vpack.c.bf16 %v922_v30, %v920_v29 }
 0x178   : > { %v991_v36 = vpack.c.bf16 %v923_v33, %v921_v32 }
 0x179   : > { %3171 = vmatmul.mubr.bf16.gmra.mrb[68].mxu0 %v975_v35 }
 0x17a   : > { %v789_v37 = vpop.f32.mrb[16].mxu0  ;;  %3089 = vmatmul.mubr.bf16.gmra.mrb[4].mxu1 %v991_v36 }
 0x17b   : > { %v791_v39 = vpop.f32.mrb[17].mxu0  ;;  %v924_v41 = vmax.f32 %v789_v37, 0.0 }
 0x17c   : > { %v793_v40 = vpop.f32.mrb[18].mxu0  ;;  %v925_v44 = vmax.f32 %v791_v39, 0.0 }
 0x17d   : > { %v926_v42 = vmax.f32 %v793_v40, 0.0  ;;  %v795_v43 = vpop.f32.mrb[19].mxu0 }
 0x17e   : > { %v927_v45 = vmax.f32 %v795_v43, 0.0 }
 0x17f   : > { %v976_v47 = vpack.c.bf16 %v926_v42, %v924_v41 }
 0x180   : > { %v992_v48 = vpack.c.bf16 %v927_v45, %v925_v44 }
 0x181   : > { %3174 = vmatprep.mubr.bf16.mxu0 %v976_v47 }
 0x182   : > { %v799_v49 = vpop.f32.mrb[20].mxu0  ;;  %3092 = vmatprep.mubr.bf16.mxu1 %v992_v48 }
 0x183   : > { %v801_v51 = vpop.f32.mrb[21].mxu0  ;;  %v928_v54 = vmax.f32 %v799_v49, 0.0 }
 0x184   : > { %v803_v52 = vpop.f32.mrb[22].mxu0  ;;  %v929_v57 = vmax.f32 %v801_v51, 0.0 }
 0x185   : > { %v930_v55 = vmax.f32 %v803_v52, 0.0  ;;  %v805_v56 = vpop.f32.mrb[23].mxu0 }
 0x186   : > { %v931_v58 = vmax.f32 %v805_v56, 0.0 }
 0x187   : > { %v977_v60 = vpack.c.bf16 %v930_v55, %v928_v54 }
 0x188   : > { %v993_v62 = vpack.c.bf16 %v931_v58, %v929_v57 }
 0x189   : > { %3175 = vmatmul.mubr.bf16.gmra.mrb[72].mxu0 %v977_v60 }
 0x18a   : > { %v809_v63 = vpop.f32.mrb[24].mxu0  ;;  %3093 = vmatmul.mubr.bf16.gmra.mrb[8].mxu1 %v993_v62 }
 0x18b   : > { %v811_v2 = vpop.f32.mrb[25].mxu0  ;;  %v932_v4 = vmax.f32 %v809_v63, 0.0 }
 0x18c   : > { %v813_v3 = vpop.f32.mrb[26].mxu0  ;;  %v933_v7 = vmax.f32 %v811_v2, 0.0 }
 0x18d   : > { %v934_v5 = vmax.f32 %v813_v3, 0.0  ;;  %v815_v6 = vpop.f32.mrb[27].mxu0 }
 0x18e   : > { %v935_v8 = vmax.f32 %v815_v6, 0.0 }
 0x18f   : > { %v978_v11 = vpack.c.bf16 %v934_v5, %v932_v4 }
 0x190   : > { %v994_v12 = vpack.c.bf16 %v935_v8, %v933_v7 }
 0x191   : > { %3178 = vmatprep.mubr.bf16.mxu0 %v978_v11 }
 0x192   : > { %v819_v13 = vpop.f32.mrb[28].mxu0  ;;  %3096 = vmatprep.mubr.bf16.mxu1 %v994_v12 }
 0x193   : > { %v821_v16 = vpop.f32.mrb[29].mxu0  ;;  %v936_v18 = vmax.f32 %v819_v13, 0.0 }
 0x194   : > { %v823_v17 = vpop.f32.mrb[30].mxu0  ;;  %v937_v21 = vmax.f32 %v821_v16, 0.0 }
 0x195   : > { %v938_v19 = vmax.f32 %v823_v17, 0.0  ;;  %v825_v20 = vpop.f32.mrb[31].mxu0 }
 0x196   : > { %v939_v23 = vmax.f32 %v825_v20, 0.0 }
 0x197   : > { %v979_v25 = vpack.c.bf16 %v938_v19, %v936_v18 }
 0x198   : > { %v995_v27 = vpack.c.bf16 %v939_v23, %v937_v21 }
 0x199   : > { %3179 = vmatmul.mubr.bf16.gmra.mrb[76].mxu0 %v979_v25 }
 0x19a   : > { %v829_v28 = vpop.f32.mrb[32].mxu0  ;;  %3097 = vmatmul.mubr.bf16.gmra.mrb[12].mxu1 %v995_v27 }
 0x19b   : > { %v831_v29 = vpop.f32.mrb[33].mxu0  ;;  %v940_v31 = vmax.f32 %v829_v28, 0.0 }
 0x19c   : > { %v833_v30 = vpop.f32.mrb[34].mxu0  ;;  %v941_v35 = vmax.f32 %v831_v29, 0.0 }
 0x19d   : > { %v942_v32 = vmax.f32 %v833_v30, 0.0  ;;  %v835_v33 = vpop.f32.mrb[35].mxu0 }
 0x19e   : > { %v943_v36 = vmax.f32 %v835_v33, 0.0 }
 0x19f   : > { %v980_v37 = vpack.c.bf16 %v942_v32, %v940_v31 }
 0x1a0   : > { %v996_v39 = vpack.c.bf16 %v943_v36, %v941_v35 }
 0x1a1   : > { %3182 = vmatprep.mubr.bf16.mxu0 %v980_v37 }
 0x1a2   : > { %v839_v40 = vpop.f32.mrb[36].mxu0  ;;  %3100 = vmatprep.mubr.bf16.mxu1 %v996_v39 }
 0x1a3   : > { %v841_v41 = vpop.f32.mrb[37].mxu0  ;;  %v944_v43 = vmax.f32 %v839_v40, 0.0 }
 0x1a4   : > { %v843_v42 = vpop.f32.mrb[38].mxu0  ;;  %v945_v47 = vmax.f32 %v841_v41, 0.0 }
 0x1a5   : > { %v946_v44 = vmax.f32 %v843_v42, 0.0  ;;  %v845_v45 = vpop.f32.mrb[39].mxu0 }
 0x1a6   : > { %v947_v48 = vmax.f32 %v845_v45, 0.0 }
 0x1a7   : > { %v981_v49 = vpack.c.bf16 %v946_v44, %v944_v43 }
 0x1a8   : > { %v997_v51 = vpack.c.bf16 %v947_v48, %v945_v47 }
 0x1a9   : > { %3183 = vmatmul.mubr.bf16.gmra.mrb[80].mxu0 %v981_v49 }
 0x1aa   : > { %v849_v52 = vpop.f32.mrb[40].mxu0  ;;  %3101 = vmatmul.mubr.bf16.gmra.mrb[16].mxu1 %v997_v51 }
 0x1ab   : > { %v851_v54 = vpop.f32.mrb[41].mxu0  ;;  %v948_v56 = vmax.f32 %v849_v52, 0.0 }
 0x1ac   : > { %v853_v55 = vpop.f32.mrb[42].mxu0  ;;  %v949_v60 = vmax.f32 %v851_v54, 0.0 }
 0x1ad   : > { %v950_v57 = vmax.f32 %v853_v55, 0.0  ;;  %v855_v58 = vpop.f32.mrb[43].mxu0 }
 0x1ae   : > { %v951_v62 = vmax.f32 %v855_v58, 0.0 }
 0x1af   : > { %v982_v63 = vpack.c.bf16 %v950_v57, %v948_v56 }
 0x1b0   : > { %v998_v2 = vpack.c.bf16 %v951_v62, %v949_v60 }
 0x1b1   : > { %3186 = vmatprep.mubr.bf16.mxu0 %v982_v63 }
 0x1b2   : > { %v859_v3 = vpop.f32.mrb[44].mxu0  ;;  %3104 = vmatprep.mubr.bf16.mxu1 %v998_v2 }
 0x1b3   : > { %v861_v4 = vpop.f32.mrb[45].mxu0  ;;  %v952_v6 = vmax.f32 %v859_v3, 0.0 }
 0x1b4   : > { %v863_v5 = vpop.f32.mrb[46].mxu0  ;;  %v953_v11 = vmax.f32 %v861_v4, 0.0 }
 0x1b5   : > { %v954_v7 = vmax.f32 %v863_v5, 0.0  ;;  %v865_v8 = vpop.f32.mrb[47].mxu0 }
 0x1b6   : > { %v955_v12 = vmax.f32 %v865_v8, 0.0 }
 0x1b7   : > { %v983_v13 = vpack.c.bf16 %v954_v7, %v952_v6 }
 0x1b8   : > { %v999_v16 = vpack.c.bf16 %v955_v12, %v953_v11 }
 0x1b9   : > { %3187 = vmatmul.mubr.bf16.gmra.mrb[84].mxu0 %v983_v13 }
 0x1ba   : > { %v869_v17 = vpop.f32.mrb[48].mxu0  ;;  %3105 = vmatmul.mubr.bf16.gmra.mrb[20].mxu1 %v999_v16 }
 0x1bb   : > { %v871_v18 = vpop.f32.mrb[49].mxu0  ;;  %v956_v20 = vmax.f32 %v869_v17, 0.0 }
 0x1bc   : > { %v873_v19 = vpop.f32.mrb[50].mxu0  ;;  %v957_v25 = vmax.f32 %v871_v18, 0.0 }
 0x1bd   : > { %v958_v21 = vmax.f32 %v873_v19, 0.0  ;;  %v875_v23 = vpop.f32.mrb[51].mxu0 }
 0x1be   : > { %v959_v27 = vmax.f32 %v875_v23, 0.0 }
 0x1bf   : > { %v984_v28 = vpack.c.bf16 %v958_v21, %v956_v20 }
 0x1c0   : > { %v1000_v29 = vpack.c.bf16 %v959_v27, %v957_v25 }
 0x1c1   : > { %3190 = vmatprep.mubr.bf16.mxu0 %v984_v28 }
 0x1c2   : > { %v879_v30 = vpop.f32.mrb[52].mxu0  ;;  %3108 = vmatprep.mubr.bf16.mxu1 %v1000_v29 }
 0x1c3   : > { %v881_v31 = vpop.f32.mrb[53].mxu0  ;;  %v960_v33 = vmax.f32 %v879_v30, 0.0 }
 0x1c4   : > { %v883_v32 = vpop.f32.mrb[54].mxu0  ;;  %v961_v37 = vmax.f32 %v881_v31, 0.0 }
 0x1c5   : > { %v962_v35 = vmax.f32 %v883_v32, 0.0  ;;  %v885_v36 = vpop.f32.mrb[55].mxu0 }
 0x1c6   : > { %v963_v39 = vmax.f32 %v885_v36, 0.0 }
 0x1c7   : > { %v985_v40 = vpack.c.bf16 %v962_v35, %v960_v33 }
 0x1c8   : > { %v1001_v41 = vpack.c.bf16 %v963_v39, %v961_v37 }
 0x1c9   : > { %3191 = vmatmul.mubr.bf16.gmra.mrb[88].mxu0 %v985_v40 }
 0x1ca   : > { %v889_v42 = vpop.f32.mrb[56].mxu0  ;;  %3109 = vmatmul.mubr.bf16.gmra.mrb[24].mxu1 %v1001_v41 }
 0x1cb   : > { %v891_v43 = vpop.f32.mrb[57].mxu0  ;;  %v964_v45 = vmax.f32 %v889_v42, 0.0 }
 0x1cc   : > { %v893_v44 = vpop.f32.mrb[58].mxu0  ;;  %v965_v49 = vmax.f32 %v891_v43, 0.0 }
 0x1cd   : > { %v966_v47 = vmax.f32 %v893_v44, 0.0  ;;  %v895_v48 = vpop.f32.mrb[59].mxu0 }
 0x1ce   : > { %v967_v51 = vmax.f32 %v895_v48, 0.0 }
 0x1cf   : > { %v986_v52 = vpack.c.bf16 %v966_v47, %v964_v45 }
 0x1d0   : > { %v1002_v54 = vpack.c.bf16 %v967_v51, %v965_v49 }
 0x1d1   : > { %3194 = vmatprep.mubr.bf16.mxu0 %v986_v52 }
 0x1d2   : > { %v899_v55 = vpop.f32.mrb[60].mxu0  ;;  %3112 = vmatprep.mubr.bf16.mxu1 %v1002_v54 }
 0x1d3   : > { %v901_v56 = vpop.f32.mrb[61].mxu0  ;;  %v968_v58 = vmax.f32 %v899_v55, 0.0 }
 0x1d4   : > { %v903_v57 = vpop.f32.mrb[62].mxu0  ;;  %v969_v63 = vmax.f32 %v901_v56, 0.0 }
 0x1d5   : > { %v970_v60 = vmax.f32 %v903_v57, 0.0  ;;  %v905_v62 = vpop.f32.mrb[63].mxu0 }
 0x1d6   : > { %v971_v2 = vmax.f32 %v905_v62, 0.0 }
 0x1d7   : > { %v987_v3 = vpack.c.bf16 %v970_v60, %v968_v58 }
 0x1d8   : > { %v1003_v4 = vpack.c.bf16 %v971_v2, %v969_v63 }
 0x1d9   : > { %3195 = vmatmul.mubr.bf16.gmra.mrb[92].mxu0 %v987_v3 }
 0x1da   : > { %3113 = vmatmul.mubr.bf16.gmra.mrb[28].mxu1 %v1003_v4 }
 0x1db   : > { %3118 = vmatprep.mubr.msk.bf16.mxu1 %vm1325_vm2, %v4079_v53 }
 0x1e2   : > { %3119 = vmatmul.mubr.msk.bf16.vlgmr.msra.gmra.mrb[32].mxu1 %vm1325_vm2, %v4083_v61 }
 0x1e3   : > { %3122 = vmatprep.mubr.msk.bf16.mxu1 %vm1325_vm2, %v4087_v1 }
 0x1ea   : > { %3123 = vmatmul.mubr.msk.bf16.gmra.mrb[36].mxu1 %vm1325_vm2, %v4091_v9 }
 0x1eb   : > { %3126 = vmatprep.mubr.msk.bf16.mxu1 %vm1325_vm2, %v4096_v14 }
 0x1f2   : > { %3127 = vmatmul.mubr.msk.bf16.gmra.mrb[40].mxu1 %vm1325_vm2, %v4100_v22 }
 0x1f3   : > { %3130 = vmatprep.mubr.msk.bf16.mxu1 %vm1325_vm2, %v4104_v26 }
 0x1fa   : > { %3131 = vmatmul.mubr.msk.bf16.gmra.mrb[44].mxu1 %vm1325_vm2, %v4108_v34 }
 0x1fb   : > { %3134 = vmatprep.mubr.msk.bf16.mxu1 %vm1325_vm2, %v4112_v38 }
 0x202   : > { %3135 = vmatmul.mubr.msk.bf16.gmra.mrb[48].mxu1 %vm1325_vm2, %v4116_v46 }
 0x203   : > { %3138 = vmatprep.mubr.msk.bf16.mxu1 %vm1325_vm2, %v4120_v50 }
 0x20a   : > { %3139 = vmatmul.mubr.msk.bf16.gmra.mrb[52].mxu1 %vm1325_vm2, %v4124_v59 }
 0x20b   : > { %3142 = vmatprep.mubr.msk.bf16.mxu1 %vm1325_vm2, %v4128_v0 }
 0x212   : > { %3143 = vmatmul.mubr.msk.bf16.gmra.mrb[56].mxu1 %vm1325_vm2, %v4132_v10 }
 0x213   : > { %3146 = vmatprep.mubr.msk.bf16.mxu1 %vm1325_vm2, %v4136_v15 }
 0x21a   : > { %3147 = vmatmul.mubr.msk.bf16.gmra.mrb[60].mxu1 %vm1325_vm2, %v4140_v24 }
 0x23c   : > { %v4175_v53 = vpop.f32.mrb[64].mxu0 }
 0x23d   : > { %v4177_v61 = vpop.f32.mrb[0].mxu1  ;;  %v4179_v1 = vpop.f32.mrb[65].mxu0 }
 0x23e   : > { %v4181_v9 = vpop.f32.mrb[1].mxu1  ;;  %v4183_v14 = vpop.f32.mrb[66].mxu0 }
 0x23f   : > { %v4185_v22 = vpop.f32.mrb[2].mxu1  ;;  %v4187_v26 = vpop.f32.mrb[67].mxu0 }
 0x240   : > { %v4189_v34 = vpop.f32.mrb[3].mxu1 }
 0x24c   : > { %v4191_v38 = vpop.f32.mrb[68].mxu0 }
 0x24d   : > { %v4193_v46 = vpop.f32.mrb[4].mxu1  ;;  %v4195_v50 = vpop.f32.mrb[69].mxu0 }
 0x24e   : > { %v4197_v59 = vpop.f32.mrb[5].mxu1  ;;  %v4199_v0 = vpop.f32.mrb[70].mxu0 }
 0x24f   : > { %v4201_v10 = vpop.f32.mrb[6].mxu1  ;;  %v4203_v15 = vpop.f32.mrb[71].mxu0 }
 0x250   : > { %4868 = vst [vmem:[#allocation27_spill] sm:$0xff] %v4201_v10  ;;  %v4205_v24 = vpop.f32.mrb[7].mxu1 }
 0x251   : > { %4869 = vst [vmem:[#allocation28_spill] sm:$0xff] %v4205_v24 }
 0x25c   : > { %v4207_v5 = vpop.f32.mrb[72].mxu0 }
 0x25d   : > { %v4209_v6 = vpop.f32.mrb[8].mxu1  ;;  %v4211_v7 = vpop.f32.mrb[73].mxu0 }
 0x25e   : > { %4870 = vst [vmem:[#allocation29_spill] sm:$0xff] %v4209_v6  ;;  %v4213_v8 = vpop.f32.mrb[9].mxu1  ;;  %v4215_v11 = vpop.f32.mrb[74].mxu0 }
 0x25f   : > { %4871 = vst [vmem:[#allocation30_spill] sm:$0xff] %v4213_v8  ;;  %v4217_v12 = vpop.f32.mrb[10].mxu1  ;;  %v4219_v13 = vpop.f32.mrb[75].mxu0 }
 0x260   : > { %4872 = vst [vmem:[#allocation31_spill] sm:$0xff] %v4217_v12  ;;  %v4221_v16 = vpop.f32.mrb[11].mxu1 }
 0x261   : > { %4873 = vst [vmem:[#allocation32_spill] sm:$0xff] %v4221_v16 }
 0x26c   : > { %v4223_v17 = vpop.f32.mrb[76].mxu0 }
 0x26d   : > { %v4225_v18 = vpop.f32.mrb[12].mxu1  ;;  %v4227_v19 = vpop.f32.mrb[77].mxu0 }
 0x26e   : > { %4874 = vst [vmem:[#allocation33_spill] sm:$0xff] %v4225_v18  ;;  %v4229_v20 = vpop.f32.mrb[13].mxu1  ;;  %v4231_v21 = vpop.f32.mrb[78].mxu0 }
 0x26f   : > { %4875 = vst [vmem:[#allocation34_spill] sm:$0xff] %v4229_v20  ;;  %v4233_v23 = vpop.f32.mrb[14].mxu1  ;;  %v4235_v25 = vpop.f32.mrb[79].mxu0 }
 0x270   : > { %4876 = vst [vmem:[#allocation35_spill] sm:$0xff] %v4233_v23  ;;  %v4237_v27 = vpop.f32.mrb[15].mxu1 }
 0x271   : > { %4877 = vst [vmem:[#allocation36_spill] sm:$0xff] %v4237_v27 }
 0x27c   : > { %v4239_v28 = vpop.f32.mrb[80].mxu0 }
 0x27d   : > { %v4241_v29 = vpop.f32.mrb[16].mxu1  ;;  %v4243_v30 = vpop.f32.mrb[81].mxu0 }
 0x27e   : > { %4878 = vst [vmem:[#allocation37_spill] sm:$0xff] %v4241_v29  ;;  %v4245_v31 = vpop.f32.mrb[17].mxu1  ;;  %v4247_v32 = vpop.f32.mrb[82].mxu0 }
 0x27f   : > { %4879 = vst [vmem:[#allocation38_spill] sm:$0xff] %v4245_v31  ;;  %v4249_v33 = vpop.f32.mrb[18].mxu1  ;;  %v4251_v35 = vpop.f32.mrb[83].mxu0 }
 0x280   : > { %4880 = vst [vmem:[#allocation39_spill] sm:$0xff] %v4249_v33  ;;  %v4253_v36 = vpop.f32.mrb[19].mxu1 }
 0x281   : > { %4881 = vst [vmem:[#allocation40_spill] sm:$0xff] %v4253_v36 }
 0x28c   : > { %v4255_v37 = vpop.f32.mrb[84].mxu0 }
 0x28d   : > { %v4257_v39 = vpop.f32.mrb[20].mxu1  ;;  %v4259_v40 = vpop.f32.mrb[85].mxu0 }
 0x28e   : > { %4882 = vst [vmem:[#allocation41_spill] sm:$0xff] %v4257_v39  ;;  %v4261_v41 = vpop.f32.mrb[21].mxu1  ;;  %v4263_v42 = vpop.f32.mrb[86].mxu0  ;;  %v4307_v39 = vld [vmem:[#allocation8 + $0x8] sm:$0xff]  }
 0x28f   : > { %4883 = vst [vmem:[#allocation42_spill] sm:$0xff] %v4261_v41  ;;  %v4265_v43 = vpop.f32.mrb[22].mxu1  ;;  %v4267_v44 = vpop.f32.mrb[87].mxu0 }
 0x290   : > { %4884 = vst [vmem:[#allocation43_spill] sm:$0xff] %v4265_v43  ;;  %v4269_v45 = vpop.f32.mrb[23].mxu1 }
 0x291   : > { %4885 = vst [vmem:[#allocation44_spill] sm:$0xff] %v4269_v45 }
 0x29c   : > { %v4271_v47 = vpop.f32.mrb[88].mxu0 }
 0x29d   : > { %v4273_v48 = vpop.f32.mrb[24].mxu1  ;;  %v4275_v49 = vpop.f32.mrb[89].mxu0 }
 0x29e   : > { %4886 = vst [vmem:[#allocation45_spill] sm:$0xff] %v4273_v48  ;;  %v4277_v51 = vpop.f32.mrb[25].mxu1  ;;  %v4279_v52 = vpop.f32.mrb[90].mxu0 }
 0x29f   : > { %4887 = vst [vmem:[#allocation46_spill] sm:$0xff] %v4277_v51  ;;  %v4281_v54 = vpop.f32.mrb[26].mxu1  ;;  %v4283_v55 = vpop.f32.mrb[91].mxu0 }
 0x2a0   : > { %4888 = vst [vmem:[#allocation47_spill] sm:$0xff] %v4281_v54  ;;  %v4285_v56 = vpop.f32.mrb[27].mxu1  ;;  %v4303_v54 = vld [vmem:[#allocation8] sm:$0xff]  }
 0x2a1   : > { %4889 = vst [vmem:[#allocation48_spill] sm:$0xff] %v4285_v56  ;;  %3198 = vmatprep.subr.bf16.mxu1 %v4303_v54 }
 0x2a2   : > { %3199 = vmatpush3.bf16.msra.mxu1 %v4303_v54 }
 0x2a3   : > { %3200 = vmatprep.subr.bf16.mxu1 %v4307_v39 }
 0x2a6   : > { %3201 = vmatpush3.bf16.msra.mxu1 %v4307_v39 }
 0x2ac   : > { %v4287_v57 = vpop.f32.mrb[92].mxu0 }
 0x2ad   : > { %v4289_v58 = vpop.f32.mrb[28].mxu1  ;;  %v4291_v60 = vpop.f32.mrb[93].mxu0 }
 0x2ae   : > { %4890 = vst [vmem:[#allocation49_spill] sm:$0xff] %v4289_v58  ;;  %v4293_v62 = vpop.f32.mrb[29].mxu1  ;;  %v4295_v63 = vpop.f32.mrb[94].mxu0 }
 0x2af   : > { %4891 = vst [vmem:[#allocation50_spill] sm:$0xff] %v4293_v62  ;;  %v4297_v2 = vpop.f32.mrb[30].mxu1  ;;  %v4299_v3 = vpop.f32.mrb[95].mxu0 }
 0x2b0   : > { %4892 = vst [vmem:[#allocation51_spill] sm:$0xff] %v4297_v2  ;;  %v4301_v4 = vpop.f32.mrb[31].mxu1  ;;  %v4309_v2 = vld [vmem:[#allocation8 + $0x10] sm:$0xff]  }
 0x2b1   : > { %4893 = vst [vmem:[#allocation52_spill] sm:$0xff] %v4301_v4  ;;  %3202 = vmatprep.subr.bf16.mxu1 %v4309_v2 }
 0x2b2   : > { %3203 = vmatpush3.bf16.msra.mxu1 %v4309_v2 }
 0x2b5   : > { %v3120_v51 = vpop.f32.mrb[32].mxu1 }
 0x2b6   : > { %v2886_v56 = vadd.f32 -1.0, %v3120_v51  ;;  %v1412_v48 = vpop.f32.mrb[33].mxu1 }
 0x2b7   : > { %v2884_v58 = vadd.f32 -1.0, %v1412_v48  ;;  %v3121_v45 = vpop.f32.mrb[34].mxu1 }
 0x2b8   : > { %v1573_v62 = vmul.f32 1e+30, %v2886_v56  ;;  %v2887_v43 = vadd.f32 -1.0, %v3121_v45  ;;  %v1415_v41 = vpop.f32.mrb[35].mxu1  ;;  %v4323_v56 = vld [vmem:[#allocation8 + $0x18] sm:$0xff]  }
 0x2b9   : > { %v1571_v36 = vmul.f32 1e+30, %v2884_v58  ;;  %v2885_v4 = vadd.f32 -1.0, %v1415_v41  ;;  %3204 = vmatprep.subr.bf16.mxu1 %v4323_v56 }
 0x2ba   : > { %v4312_v33 = vadd.f32 %v4175_v53, %v1573_v62  ;;  %v1574_v51 = vmul.f32 1e+30, %v2887_v43  ;;  %3205 = vmatpush3.bf16.msra.mxu1 %v4323_v56 }
 0x2bb   : > { %v4316_v48 = vadd.f32 %v4179_v1, %v1571_v36  ;;  %v1572_v31 = vmul.f32 1e+30, %v2885_v4 }
 0x2bc   : > { %v4320_v45 = vadd.f32 %v4183_v14, %v1574_v51 }
 0x2bd   : > { %v4326_v41 = vadd.f32 %v4187_v26, %v1572_v31  ;;  %v3124_v53 = vpop.f32.mrb[36].mxu1 }
 0x2be   : > { %v2890_v43 = vadd.f32 -1.0, %v3124_v53  ;;  %v1428_v58 = vpop.f32.mrb[37].mxu1 }
 0x2bf   : > { %v2888_v62 = vadd.f32 -1.0, %v1428_v58  ;;  %v3125_v29 = vpop.f32.mrb[38].mxu1  ;;  %v1814_v23 = vsel %vm1812_vm3, %v4326_v41, -inf }
 0x2c0   : > { %v1577_v1 = vmul.f32 1e+30, %v2890_v43  ;;  %v2891_v36 = vadd.f32 -1.0, %v3125_v29  ;;  %v1431_v4 = vpop.f32.mrb[39].mxu1  ;;  %v1815_v43 = vsel %vm1812_vm3, %v4312_v33, -inf }
 0x2c1   : > { %v1575_v14 = vmul.f32 1e+30, %v2888_v62  ;;  %v2889_v51 = vadd.f32 -1.0, %v1431_v4  ;;  %v1816_v4 = vsel %vm1812_vm3, %v4320_v45, -inf }
 0x2c2   : > { %v4331_v27 = vadd.f32 %v4191_v38, %v1577_v1  ;;  %v1578_v26 = vmul.f32 1e+30, %v2891_v36  ;;  %v1813_v38 = vsel %vm1812_vm3, %v4316_v48, -inf }
 0x2c3   : > { %v4334_v31 = vadd.f32 %v4195_v50, %v1575_v14  ;;  %v1576_v53 = vmul.f32 1e+30, %v2889_v51 }
 0x2c4   : > { %v1821_v29 = vsel %vm1812_vm3, %v4331_v27, -inf  ;;  %v4342_v58 = vadd.f32 %v4199_v0, %v1578_v26 }
 0x2c5   : > { %v1822_v62 = vmax.f32 %v1815_v43, %v1821_v29  ;;  %v1817_v50 = vsel %vm1812_vm3, %v4334_v31, -inf  ;;  %v4349_v1 = vadd.f32 %v4203_v15, %v1576_v53  ;;  %v3128_v36 = vpop.f32.mrb[40].mxu1 }
 0x2c6   : > { %v1818_v14 = vmax.f32 %v1813_v38, %v1817_v50  ;;  %v1823_v51 = vsel %vm1812_vm3, %v4342_v58, -inf  ;;  %v2894_v0 = vadd.f32 -1.0, %v3128_v36  ;;  %v1444_v26 = vpop.f32.mrb[41].mxu1 }
 0x2c7   : > { %v1824_v43 = vmax.f32 %v1816_v4, %v1823_v51  ;;  %v1819_v29 = vsel %vm1812_vm3, %v4349_v1, -inf  ;;  %v2892_v20 = vadd.f32 -1.0, %v1444_v26  ;;  %v3129_v15 = vpop.f32.mrb[42].mxu1 }
 0x2c8   : > { %v1820_v53 = vmax.f32 %v1814_v23, %v1819_v29  ;;  %v1581_v18 = vmul.f32 1e+30, %v2894_v0  ;;  %v2895_v16 = vadd.f32 -1.0, %v3129_v15  ;;  %v1447_v12 = vpop.f32.mrb[43].mxu1 }
 0x2c9   : > { %v1579_v8 = vmul.f32 1e+30, %v2892_v20  ;;  %v2893_v38 = vadd.f32 -1.0, %v1447_v12 }
 0x2ca   : > { %v4360_v50 = vadd.f32 %v4207_v5, %v1581_v18  ;;  %v1582_v36 = vmul.f32 1e+30, %v2895_v16 }
 0x2cb   : > { %v4363_v6 = vadd.f32 %v4211_v7, %v1579_v8  ;;  %v1580_v24 = vmul.f32 1e+30, %v2893_v38 }
 0x2cc   : > { %v1829_v4 = vsel %vm1812_vm3, %v4360_v50, -inf  ;;  %v4368_v51 = vadd.f32 %v4215_v11, %v1582_v36 }
 0x2cd   : > { %v1830_v23 = vmax.f32 %v1822_v62, %v1829_v4  ;;  %v1825_v0 = vsel %vm1812_vm3, %v4363_v6, -inf  ;;  %v4373_v12 = vadd.f32 %v4219_v13, %v1580_v24  ;;  %v3132_v5 = vpop.f32.mrb[44].mxu1 }
 0x2ce   : > { %v1826_v18 = vmax.f32 %v1818_v14, %v1825_v0  ;;  %v1831_v7 = vsel %vm1812_vm3, %v4368_v51, -inf  ;;  %v2898_v8 = vadd.f32 -1.0, %v3132_v5  ;;  %v1460_v16 = vpop.f32.mrb[45].mxu1 }
 0x2cf   : > { %v1832_v20 = vmax.f32 %v1824_v43, %v1831_v7  ;;  %v1827_v26 = vsel %vm1812_vm3, %v4373_v12, -inf  ;;  %v2896_v11 = vadd.f32 -1.0, %v1460_v16  ;;  %v3133_v29 = vpop.f32.mrb[46].mxu1 }
 0x2d0   : > { %v1828_v62 = vmax.f32 %v1820_v53, %v1827_v26  ;;  %v1585_v15 = vmul.f32 1e+30, %v2898_v8  ;;  %v2899_v38 = vadd.f32 -1.0, %v3133_v29  ;;  %v1463_v36 = vpop.f32.mrb[47].mxu1 }
 0x2d1   : > { %v1583_v4 = vmul.f32 1e+30, %v2896_v11  ;;  %v2897_v24 = vadd.f32 -1.0, %v1463_v36 }
 0x2d2   : > { %v4380_v13 = vadd.f32 %v4223_v17, %v1585_v15  ;;  %v1586_v14 = vmul.f32 1e+30, %v2899_v38 }
 0x2d3   : > { %v4383_v0 = vadd.f32 %v4227_v19, %v1583_v4  ;;  %v1584_v5 = vmul.f32 1e+30, %v2897_v24 }
 0x2d4   : > { %v1837_v43 = vsel %vm1812_vm3, %v4380_v13, -inf  ;;  %v4388_v7 = vadd.f32 %v4231_v21, %v1586_v14 }
 0x2d5   : > { %v1838_v53 = vmax.f32 %v1830_v23, %v1837_v43  ;;  %v1833_v8 = vsel %vm1812_vm3, %v4383_v0, -inf  ;;  %v4393_v16 = vadd.f32 %v4235_v25, %v1584_v5  ;;  %v3136_v17 = vpop.f32.mrb[48].mxu1 }
 0x2d6   : > { %v1834_v26 = vmax.f32 %v1826_v18, %v1833_v8  ;;  %v1839_v19 = vsel %vm1812_vm3, %v4388_v7, -inf  ;;  %v2902_v11 = vadd.f32 -1.0, %v3136_v17  ;;  %v1476_v29 = vpop.f32.mrb[49].mxu1 }
 0x2d7   : > { %v1840_v15 = vmax.f32 %v1832_v20, %v1839_v19  ;;  %v1835_v38 = vsel %vm1812_vm3, %v4393_v16, -inf  ;;  %v2900_v21 = vadd.f32 -1.0, %v1476_v29  ;;  %v3137_v36 = vpop.f32.mrb[50].mxu1 }
 0x2d8   : > { %v1836_v23 = vmax.f32 %v1828_v62, %v1835_v38  ;;  %v1589_v4 = vmul.f32 1e+30, %v2902_v11  ;;  %v2903_v24 = vadd.f32 -1.0, %v3137_v36  ;;  %v1479_v14 = vpop.f32.mrb[51].mxu1 }
 0x2d9   : > { %v1587_v43 = vmul.f32 1e+30, %v2900_v21  ;;  %v2901_v25 = vadd.f32 -1.0, %v1479_v14 }
 0x2da   : > { %v4400_v5 = vadd.f32 %v4239_v28, %v1589_v4  ;;  %v1590_v18 = vmul.f32 1e+30, %v2903_v24 }
 0x2db   : > { %v4403_v8 = vadd.f32 %v4243_v30, %v1587_v43  ;;  %v1588_v17 = vmul.f32 1e+30, %v2901_v25 }
 0x2dc   : > { %v1845_v20 = vsel %vm1812_vm3, %v4400_v5, -inf  ;;  %v4408_v19 = vadd.f32 %v4247_v32, %v1590_v18 }
 0x2dd   : > { %v1846_v62 = vmax.f32 %v1838_v53, %v1845_v20  ;;  %v1841_v11 = vsel %vm1812_vm3, %v4403_v8, -inf  ;;  %v4413_v29 = vadd.f32 %v4251_v35, %v1588_v17  ;;  %v3140_v28 = vpop.f32.mrb[52].mxu1  ;;  %v4848_v20 = vmov 0.0|0.0  }
 0x2de   : > { %v1842_v38 = vmax.f32 %v1834_v26, %v1841_v11  ;;  %v1847_v30 = vsel %vm1812_vm3, %v4408_v19, -inf  ;;  %v2906_v21 = vadd.f32 -1.0, %v3140_v28  ;;  %v1492_v36 = vpop.f32.mrb[53].mxu1  ;;  %3257 = vmatprep.subr.bf16.mxu1 %v4848_v20 }
 0x2df   : > { %v1848_v4 = vmax.f32 %v1840_v15, %v1847_v30  ;;  %v1843_v24 = vsel %vm1812_vm3, %v4413_v29, -inf  ;;  %v2904_v32 = vadd.f32 -1.0, %v1492_v36  ;;  %v3141_v14 = vpop.f32.mrb[54].mxu1 }
 0x2e0   : > { %v1844_v53 = vmax.f32 %v1836_v23, %v1843_v24  ;;  %v1593_v43 = vmul.f32 1e+30, %v2906_v21  ;;  %v2907_v25 = vadd.f32 -1.0, %v3141_v14  ;;  %v1495_v18 = vpop.f32.mrb[55].mxu1 }
 0x2e1   : > { %v1591_v35 = vmul.f32 1e+30, %v2904_v32  ;;  %v2905_v26 = vadd.f32 -1.0, %v1495_v18 }
 0x2e2   : > { %v4421_v17 = vadd.f32 %v4255_v37, %v1593_v43  ;;  %v1594_v11 = vmul.f32 1e+30, %v2907_v25 }
 0x2e3   : > { %v4424_v15 = vadd.f32 %v4259_v40, %v1591_v35  ;;  %v1592_v28 = vmul.f32 1e+30, %v2905_v26 }
 0x2e4   : > { %v1853_v30 = vsel %vm1812_vm3, %v4421_v17, -inf  ;;  %v4429_v23 = vadd.f32 %v4263_v42, %v1594_v11 }
 0x2e5   : > { %v1854_v21 = vmax.f32 %v1846_v62, %v1853_v30  ;;  %v1849_v36 = vsel %vm1812_vm3, %v4424_v15, -inf  ;;  %v4434_v24 = vadd.f32 %v4267_v44, %v1592_v28  ;;  %v3144_v37 = vpop.f32.mrb[56].mxu1 }
 0x2e6   : > { %v1850_v32 = vmax.f32 %v1842_v38, %v1849_v36  ;;  %v1855_v40 = vsel %vm1812_vm3, %v4429_v23, -inf  ;;  %v2910_v14 = vadd.f32 -1.0, %v3144_v37  ;;  %v1508_v43 = vpop.f32.mrb[57].mxu1 }
 0x2e7   : > { %v1856_v25 = vmax.f32 %v1848_v4, %v1855_v40  ;;  %v1851_v18 = vsel %vm1812_vm3, %v4434_v24, -inf  ;;  %v2908_v42 = vadd.f32 -1.0, %v1508_v43  ;;  %v3145_v35 = vpop.f32.mrb[58].mxu1 }
 0x2e8   : > { %v1852_v62 = vmax.f32 %v1844_v53, %v1851_v18  ;;  %v1597_v26 = vmul.f32 1e+30, %v2910_v14  ;;  %v2911_v11 = vadd.f32 -1.0, %v3145_v35  ;;  %v1511_v30 = vpop.f32.mrb[59].mxu1 }
 0x2e9   : > { %v1595_v20 = vmul.f32 1e+30, %v2908_v42  ;;  %v2909_v44 = vadd.f32 -1.0, %v1511_v30 }
 0x2ea   : > { %v4441_v28 = vadd.f32 %v4271_v47, %v1597_v26  ;;  %v1598_v38 = vmul.f32 1e+30, %v2911_v11 }
 0x2eb   : > { %v4444_v36 = vadd.f32 %v4275_v49, %v1595_v20  ;;  %v1596_v37 = vmul.f32 1e+30, %v2909_v44 }
 0x2ec   : > { %v1861_v4 = vsel %vm1812_vm3, %v4441_v28, -inf  ;;  %v4449_v40 = vadd.f32 %v4279_v52, %v1598_v38 }
 0x2ed   : > { %v1862_v53 = vmax.f32 %v1854_v21, %v1861_v4  ;;  %v1857_v14 = vsel %vm1812_vm3, %v4444_v36, -inf  ;;  %v4454_v43 = vadd.f32 %v4283_v55, %v1596_v37  ;;  %v3148_v47 = vpop.f32.mrb[60].mxu1 }
 0x2ee   : > { %v1858_v18 = vmax.f32 %v1850_v32, %v1857_v14  ;;  %v1863_v49 = vsel %vm1812_vm3, %v4449_v40, -inf  ;;  %v2914_v20 = vadd.f32 -1.0, %v3148_v47  ;;  %v1524_v42 = vpop.f32.mrb[61].mxu1 }
 0x2ef   : > { %v1864_v35 = vmax.f32 %v1856_v25, %v1863_v49  ;;  %v1859_v26 = vsel %vm1812_vm3, %v4454_v43, -inf  ;;  %v2912_v52 = vadd.f32 -1.0, %v1524_v42  ;;  %v3149_v11 = vpop.f32.mrb[62].mxu1 }
 0x2f0   : > { %v1860_v21 = vmax.f32 %v1852_v62, %v1859_v26  ;;  %v1601_v30 = vmul.f32 1e+30, %v2914_v20  ;;  %v2915_v44 = vadd.f32 -1.0, %v3149_v11  ;;  %v1527_v38 = vpop.f32.mrb[63].mxu1 }
 0x2f1   : > { %v1599_v4 = vmul.f32 1e+30, %v2912_v52  ;;  %v2913_v55 = vadd.f32 -1.0, %v1527_v38 }
 0x2f2   : > { %v4461_v37 = vadd.f32 %v4287_v57, %v1601_v30  ;;  %v1602_v32 = vmul.f32 1e+30, %v2915_v44 }
 0x2f3   : > { %v4464_v14 = vadd.f32 %v4291_v60, %v1599_v4  ;;  %v1600_v47 = vmul.f32 1e+30, %v2913_v55 }
 0x2f4   : > { %v1869_v25 = vsel %vm1812_vm3, %v4461_v37, -inf  ;;  %v4469_v49 = vadd.f32 %v4295_v63, %v1602_v32 }
 0x2f5   : > { %v1870_v62 = vmax.f32 %v1862_v53, %v1869_v25  ;;  %v1865_v20 = vsel %vm1812_vm3, %v4464_v14, -inf  ;;  %v1801_v42 = vadd.f32 %v4299_v3, %v1600_v47  ;;  %v1890_v53 = vlaneseq  ;;  %v1882_v3 = vld [vmem:[#allocation2] sm:$0x1] }
 0x2f6   : > { %v1866_v26 = vmax.f32 %v1858_v18, %v1865_v20  ;;  %v1871_v57 = vsel %vm1812_vm3, %v4469_v49, -inf }
 0x2f7   : > { %v1872_v52 = vmax.f32 %v1864_v35, %v1871_v57  ;;  %v1867_v60 = vsel %vm1812_vm3, %v1801_v42, -inf  ;;  %v4477_v10 = vshrl.u32 %v1890_v53, 7 }
 0x2f8   : > { %v1868_v11 = vmax.f32 %v1860_v21, %v1867_v60 }
 0x2f9   : > { %v1874_v30 = vmax.f32 %v1870_v62, %v1872_v52  ;;  %v1892_v35 = vsub.s32 0, %v4477_v10 }
 0x2fa   : > { %v1873_v44 = vmax.f32 %v1866_v26, %v1868_v11 }
 0x2fc   : > { %v1875_v38 = vmax.f32 %v1873_v44, %v1874_v30 }
 0x2fe   : > { %v1876_v4 = vrot.slane %v1875_v38, 4 }
 0x300   : > { %v1877_v63 = vmax.f32 %v1875_v38, %v1876_v4 }
 0x302   : > { %v1878_v55 = vrot.slane %v1877_v63, 2 }
 0x304   : > { %v1879_v32 = vmax.f32 %v1877_v63, %v1878_v55 }
 0x306   : > { %v1880_v25 = vrot.slane %v1879_v32, 1 }
 0x308   : > { %v1881_v18 = vmax.f32 %v1879_v32, %v1880_v25 }
 0x30a   : > { %v1883_v47 = vmax.f32 %v1882_v3, %v1881_v18 }
 0x30c   : > { %v1884_v20 = vsub.f32 %v1882_v3, %v1883_v47  ;;  %vm1887_vm5 = vcmp.gt.f32.partialorder %v1883_v47, -1e+29  ;;  %2575 = vst.msk [vmem:[#allocation2] sm:$0x1] %vm2111_vm4, %v1883_v47 }
 0x30d   : > { %v1888_v21 = vsel %vm1887_vm5, %v1883_v47, 0.0 }
 0x30e   : > { %v1885_v62 = vmul.f32 1.442695, %v1884_v20  ;;  %v4483_v26 = vrot.slane %v1888_v21, %v1892_v35 }
 0x310   : > { %v1924_v57 = vsub.f32 %v1801_v42, %v4483_v26  ;;  %v1895_v52 = vsub.f32 %v4316_v48, %v4483_v26  ;;  %v1896_v60 = vsub.f32 %v4326_v41, %v4483_v26  ;;  %v1897_v11 = vsub.f32 %v4312_v33, %v4483_v26 }
 0x311   : > { %v1898_v30 = vsub.f32 %v4320_v45, %v4483_v26  ;;  %v1899_v44 = vsub.f32 %v4334_v31, %v4483_v26  ;;  %v1900_v38 = vsub.f32 %v4349_v1, %v4483_v26  ;;  %3460 = vpow2.f32 %v1885_v62 }
 0x312   : > { %v1901_v42 = vsub.f32 %v4331_v27, %v4483_v26  ;;  %v1902_v48 = vsub.f32 %v4342_v58, %v4483_v26  ;;  %v1903_v41 = vsub.f32 %v4363_v6, %v4483_v26  ;;  %v1904_v33 = vsub.f32 %v4373_v12, %v4483_v26 }
 0x313   : > { %v1905_v45 = vsub.f32 %v4360_v50, %v4483_v26  ;;  %v1906_v31 = vsub.f32 %v4368_v51, %v4483_v26  ;;  %v1907_v1 = vsub.f32 %v4383_v0, %v4483_v26  ;;  %v1985_v4 = vmul.f32 1.442695, %v1924_v57 }
 0x314   : > { %v1908_v27 = vsub.f32 %v4393_v16, %v4483_v26  ;;  %v1909_v58 = vsub.f32 %v4380_v13, %v4483_v26  ;;  %v1910_v6 = vsub.f32 %v4388_v7, %v4483_v26  ;;  %v1911_v12 = vsub.f32 %v4403_v8, %v4483_v26 }
 0x315   : > { %v1912_v50 = vsub.f32 %v4413_v29, %v4483_v26  ;;  %v1913_v51 = vsub.f32 %v4400_v5, %v4483_v26  ;;  %v1914_v0 = vsub.f32 %v4408_v19, %v4483_v26  ;;  %v1915_v16 = vsub.f32 %v4424_v15, %v4483_v26 }
 0x316   : > { %v1916_v13 = vsub.f32 %v4434_v24, %v4483_v26  ;;  %v1917_v7 = vsub.f32 %v4421_v17, %v4483_v26  ;;  %v1918_v8 = vsub.f32 %v4429_v23, %v4483_v26  ;;  %v1919_v29 = vsub.f32 %v4444_v36, %v4483_v26 }
 0x317   : > { %v1920_v5 = vsub.f32 %v4454_v43, %v4483_v26  ;;  %v1921_v19 = vsub.f32 %v4441_v28, %v4483_v26  ;;  %v1926_v32 = vsub.f32 %v4469_v49, %v4483_v26  ;;  %v1927_v25 = vmul.f32 1.442695, %v1895_v52 }
 0x318   : > { %3462 = vpow2.f32 %v1985_v4  ;;  %v1929_v3 = vmul.f32 1.442695, %v1896_v60  ;;  %v1931_v18 = vmul.f32 1.442695, %v1897_v11  ;;  %v1933_v47 = vmul.f32 1.442695, %v1898_v30 }
 0x319   : > { %3464 = vpow2.f32 %v1927_v25  ;;  %v1935_v20 = vmul.f32 1.442695, %v1899_v44  ;;  %v1937_v21 = vmul.f32 1.442695, %v1900_v38  ;;  %v1939_v57 = vmul.f32 1.442695, %v1901_v42 }
 0x31a   : > { %3466 = vpow2.f32 %v1929_v3  ;;  %v1941_v55 = vmul.f32 1.442695, %v1902_v48  ;;  %v1943_v53 = vmul.f32 1.442695, %v1903_v41  ;;  %v1945_v63 = vmul.f32 1.442695, %v1904_v33 }
 0x31b   : > { %v4548_v62 = vpop.eup %3460  ;;  %3468 = vpow2.f32 %v1931_v18  ;;  %v1947_v52 = vmul.f32 1.442695, %v1905_v45  ;;  %v3526_v60 = vld [vmem:[%s4831_s5] sm:$0xf]  ;;  %v1949_v30 = vmul.f32 1.442695, %v1906_v31  ;;  %v4896_v28 = vsub.f32 %v4464_v14, %v4483_v26 }
 0x31c   : > { %3470 = vpow2.f32 %v1933_v47  ;;  %v2482_v11 = vunpack.c.l.bf16 %v3526_v60  ;;  %v1951_v44 = vmul.f32 1.442695, %v1907_v1  ;;  %v1953_v42 = vmul.f32 1.442695, %v1908_v27 }
 0x31d   : > { %3472 = vpow2.f32 %v1935_v20  ;;  %v2487_v48 = vrot.slane %v4548_v62, %v1892_v35  ;;  %v1955_v33 = vmul.f32 1.442695, %v1909_v58  ;;  %v1957_v4 = vmul.f32 1.442695, %v1910_v6 }
 0x31e   : > { %3474 = vpow2.f32 %v1937_v21  ;;  %v1959_v31 = vmul.f32 1.442695, %v1911_v12  ;;  %v1963_v27 = vmul.f32 1.442695, %v1913_v51  ;;  %v1965_v3 = vmul.f32 1.442695, %v1914_v0 }
 0x31f   : > { %3476 = vpow2.f32 %v1939_v57  ;;  %v4558_v25 = vmul.f32 %v2487_v48, %v2482_v11  ;;  %v1967_v6 = vmul.f32 1.442695, %v1915_v16  ;;  %v1969_v12 = vmul.f32 1.442695, %v1916_v13 }
 0x320   : > { %3478 = vpow2.f32 %v1941_v55  ;;  %v1973_v17 = vmul.f32 1.442695, %v1918_v8  ;;  %v4894_v60 = vmov 0.0|0.0   ;;  %v1977_v23 = vmul.f32 1.442695, %v1920_v5 }
 0x321   : > { %3480 = vpow2.f32 %v1943_v53  ;;  %v1979_v36 = vmul.f32 1.442695, %v1921_v19  ;;  %v1983_v19 = vmul.f32 1.442695, %v4896_v28 }
 0x322   : > { %v4553_v38 = vpop.eup %3462  ;;  %3482 = vpow2.f32 %v1945_v63  ;;  %v1961_v63 = vmul.f32 1.442695, %v1912_v50  ;;  %v1971_v50 = vmul.f32 1.442695, %v1917_v7 }
 0x323   : > { %v3465_v41 = vpop.eup %3464  ;;  %3484 = vpow2.f32 %v1947_v52 }
 0x324   : > { %v3467_v45 = vpop.eup %3466  ;;  %3486 = vpow2.f32 %v1949_v30  ;;  %v1975_v30 = vmul.f32 1.442695, %v1919_v29  ;;  %v4895_v29 = vsub.f32 %v4449_v40, %v4483_v26 }
 0x325   : > { %v3469_v55 = vpop.eup %3468  ;;  %3488 = vpow2.f32 %v1951_v44  ;;  %v1991_v1 = vpack.c.bf16 %v3467_v45, %v3465_v41 }
 0x326   : > { %v3471_v53 = vpop.eup %3470  ;;  %3490 = vpow2.f32 %v1953_v42 }
 0x327   : > { %v3473_v10 = vpop.eup %3472  ;;  %3492 = vpow2.f32 %v1955_v33  ;;  %v1992_v35 = vpack.c.bf16 %v3471_v53, %v3469_v55  ;;  %v2009_v18 = vunpack.c.l.bf16 %v1991_v1  ;;  %v2010_v47 = vunpack.c.h.bf16 %v1991_v1  ;;  %3206 = vmatprep.mubr.msk.bf16.mxu1 %vm1812_vm3, %v1991_v1 }
 0x328   : > { %v3475_v58 = vpop.eup %3474  ;;  %3494 = vpow2.f32 %v1957_v4  ;;  %v1981_v33 = vmul.f32 1.442695, %v4895_v29 }
 0x329   : > { %v3477_v51 = vpop.eup %3476  ;;  %3496 = vpow2.f32 %v1959_v31  ;;  %v2011_v0 = vunpack.c.l.bf16 %v1992_v35  ;;  %v2041_v20 = vsel %vm1812_vm3, %v2009_v18, 0.0  ;;  %v2042_v21 = vsel %vm1812_vm3, %v2010_v47, 0.0  ;;  %3207 = vmatmul.mubr.msk.bf16.vlgmr.msra.gmra.mrb[64].mxu1 %vm1812_vm3, %v1992_v35 }
 0x32a   : > { %v3479_v57 = vpop.eup %3478  ;;  %3498 = vpow2.f32 %v1961_v63  ;;  %v2043_v15 = vadd.f32 %v2042_v21, %v2041_v20  ;;  %v1993_v16 = vpack.c.bf16 %v3475_v58, %v3473_v10  ;;  %v2012_v52 = vunpack.c.h.bf16 %v1992_v35  ;;  %3259 = vmatpush3.bf16.msra.mxu1 %v4303_v54 }
 0x32b   : > { %v3481_v24 = vpop.eup %3480  ;;  %3500 = vpow2.f32 %v1963_v27  ;;  %v2044_v13 = vsel %vm1812_vm3, %v2011_v0, 0.0  ;;  %v1994_v7 = vpack.c.bf16 %v3479_v57, %v3477_v51  ;;  %3260 = vmatprep.subr.bf16.mxu1 %v4894_v60  ;;  %v4897_v10 = vsub.f32 %v4461_v37, %v4483_v26 }
 0x32c   : > { %v3483_v11 = vpop.eup %3482  ;;  %3502 = vpow2.f32 %v1965_v3  ;;  %v2045_v44 = vadd.f32 %v2044_v13, %v2043_v15  ;;  %v2013_v42 = vunpack.c.l.bf16 %v1993_v16  ;;  %3210 = vmatprep.mubr.msk.bf16.mxu1 %vm1812_vm3, %v1993_v16  ;;  %v2014_v8 = vunpack.c.h.bf16 %v1993_v16 }
 0x32d   : > { %v3485_v54 = vpop.eup %3484  ;;  %3504 = vpow2.f32 %v1967_v6  ;;  %v2046_v48 = vsel %vm1812_vm3, %v2012_v52, 0.0  ;;  %v2015_v5 = vunpack.c.l.bf16 %v1994_v7  ;;  %v1995_v55 = vpack.c.bf16 %v3483_v11, %v3481_v24 }
 0x32e   : > { %v3487_v41 = vpop.eup %3486  ;;  %3506 = vpow2.f32 %v1969_v12  ;;  %v2047_v45 = vadd.f32 %v2046_v48, %v2045_v44  ;;  %3262 = vmatpush3.bf16.msra.mxu1 %v4307_v39  ;;  %v2048_v43 = vsel %vm1812_vm3, %v2013_v42, 0.0  ;;  %v2050_v39 = vsel %vm1812_vm3, %v2014_v8, 0.0 }
 0x32f   : > { %v3489_v4 = vpop.eup %3488  ;;  %3508 = vpow2.f32 %v1971_v50  ;;  %3263 = vmatprep.subr.bf16.mxu1 %v4894_v60  ;;  %v1996_v40 = vpack.c.bf16 %v3487_v41, %v3485_v54  ;;  %v2016_v63 = vunpack.c.h.bf16 %v1994_v7  ;;  %v1987_v35 = vmul.f32 1.442695, %v4897_v10 }
 0x330   : > { %v3491_v31 = vpop.eup %3490  ;;  %3510 = vpow2.f32 %v1973_v17  ;;  %v2049_v1 = vadd.f32 %v2048_v43, %v2047_v45  ;;  %v1989_v47 = vmul.f32 1.442695, %v1926_v32  ;;  %v2052_v58 = vsel %vm1812_vm3, %v2015_v5, 0.0 }
 0x331   : > { %v3493_v53 = vpop.eup %3492  ;;  %3512 = vpow2.f32 %v1975_v30  ;;  %3211 = vmatmul.mubr.msk.bf16.gmra.mrb[68].mxu1 %vm1812_vm3, %v1994_v7  ;;  %v1997_v27 = vpack.c.bf16 %v3491_v31, %v3489_v4  ;;  %v2017_v6 = vunpack.c.l.bf16 %v1995_v55  ;;  %v2054_v51 = vsel %vm1812_vm3, %v2016_v63, 0.0 }
 0x332   : > { %v3495_v3 = vpop.eup %3494  ;;  %3514 = vpow2.f32 %v1977_v23  ;;  %v2051_v18 = vadd.f32 %v2050_v39, %v2049_v1  ;;  %3214 = vmatprep.mubr.msk.bf16.mxu1 %vm1812_vm3, %v1995_v55  ;;  %3265 = vmatpush3.bf16.msra.mxu1 %v4309_v2  ;;  %v2018_v0 = vunpack.c.h.bf16 %v1995_v55  ;;  %v2019_v32 = vunpack.c.l.bf16 %v1996_v40 }
 0x333   : > { %v3497_v14 = vpop.eup %3496  ;;  %3516 = vpow2.f32 %v1979_v36  ;;  %3266 = vmatprep.subr.bf16.mxu1 %v4894_v60  ;;  %v1998_v2 = vpack.c.bf16 %v3495_v3, %v3493_v53  ;;  %v2056_v26 = vsel %vm1812_vm3, %v2017_v6, 0.0  ;;  %v2020_v13 = vunpack.c.h.bf16 %v1996_v40 }
 0x334   : > { %v3499_v12 = vpop.eup %3498  ;;  %3518 = vpow2.f32 %v1981_v33  ;;  %v2053_v37 = vadd.f32 %v2052_v58, %v2051_v18  ;;  %v2058_v17 = vsel %vm1812_vm3, %v2018_v0, 0.0  ;;  %v2060_v30 = vsel %vm1812_vm3, %v2019_v32, 0.0 }
 0x335   : > { %v3501_v50 = vpop.eup %3500  ;;  %3520 = vpow2.f32 %v1983_v19  ;;  %v1999_v57 = vpack.c.bf16 %v3499_v12, %v3497_v14  ;;  %v2021_v44 = vunpack.c.l.bf16 %v1997_v27  ;;  %v2062_v48 = vsel %vm1812_vm3, %v2020_v13, 0.0 }
 0x336   : > { %v3503_v20 = vpop.eup %3502  ;;  %3522 = vpow2.f32 %v1987_v35  ;;  %v2055_v21 = vadd.f32 %v2054_v51, %v2053_v37  ;;  %3268 = vmatpush3.bf16.msra.mxu1 %v4323_v56  ;;  %v2022_v41 = vunpack.c.h.bf16 %v1997_v27  ;;  %v2023_v43 = vunpack.c.l.bf16 %v1998_v2 }
 0x337   : > { %v3505_v49 = vpop.eup %3504  ;;  %3524 = vpow2.f32 %v1989_v47  ;;  %v2000_v52 = vpack.c.bf16 %v3503_v20, %v3501_v50  ;;  %v2064_v4 = vsel %vm1812_vm3, %v2021_v44, 0.0  ;;  %v2024_v1 = vunpack.c.h.bf16 %v1998_v2 }
 0x338   : > { %v3507_v15 = vpop.eup %3506  ;;  %v2057_v16 = vadd.f32 %v2056_v26, %v2055_v21  ;;  %v2066_v19 = vsel %vm1812_vm3, %v2022_v41, 0.0  ;;  %v2068_v63 = vsel %vm1812_vm3, %v2023_v43, 0.0  ;;  %v2026_v35 = vunpack.c.h.bf16 %v1999_v57 }
 0x339   : > { %v3509_v24 = vpop.eup %3508  ;;  %3215 = vmatmul.mubr.msk.bf16.gmra.mrb[72].mxu1 %vm1812_vm3, %v1996_v40  ;;  %v2001_v7 = vpack.c.bf16 %v3507_v15, %v3505_v49  ;;  %v2070_v10 = vsel %vm1812_vm3, %v2024_v1, 0.0  ;;  %v2027_v47 = vunpack.c.l.bf16 %v2000_v52  ;;  %v2028_v12 = vunpack.c.h.bf16 %v2000_v52 }
 0x33a   : > { %v3511_v60 = vpop.eup %3510  ;;  %v2059_v11 = vadd.f32 %v2058_v17, %v2057_v16  ;;  %3218 = vmatprep.mubr.msk.bf16.mxu1 %vm1812_vm3, %v1997_v27  ;;  %v2025_v27 = vunpack.c.l.bf16 %v1999_v57  ;;  %v2074_v6 = vsel %vm1812_vm3, %v2026_v35, 0.0 }
 0x33b   : > { %v3513_v56 = vpop.eup %3512  ;;  %v2002_v42 = vpack.c.bf16 %v3511_v60, %v3509_v24  ;;  %v2076_v37 = vsel %vm1812_vm3, %v2027_v47, 0.0  ;;  %v2029_v50 = vunpack.c.l.bf16 %v2001_v7  ;;  %v2078_v0 = vsel %vm1812_vm3, %v2028_v12, 0.0 }
 0x33c   : > { %v3515_v54 = vpop.eup %3514  ;;  %v2061_v23 = vadd.f32 %v2060_v30, %v2059_v11  ;;  %v2072_v14 = vsel %vm1812_vm3, %v2025_v27, 0.0 }
 0x33d   : > { %v3517_v8 = vpop.eup %3516  ;;  %v2003_v33 = vpack.c.bf16 %v3515_v54, %v3513_v56  ;;  %v2080_v21 = vsel %vm1812_vm3, %v2029_v50, 0.0  ;;  %v2032_v32 = vunpack.c.h.bf16 %v2002_v42 }
 0x33e   : > { %v3519_v36 = vpop.eup %3518  ;;  %v2063_v29 = vadd.f32 %v2062_v48, %v2061_v23 }
 0x33f   : > { %v3521_v45 = vpop.eup %3520  ;;  %v2004_v5 = vpack.c.bf16 %v3519_v36, %v3517_v8  ;;  %v2086_v17 = vsel %vm1812_vm3, %v2032_v32, 0.0  ;;  %v2034_v13 = vunpack.c.h.bf16 %v2003_v33 }
 0x340   : > { %v3523_v55 = vpop.eup %3522  ;;  %v2065_v31 = vadd.f32 %v2064_v4, %v2063_v29  ;;  %v2005_v40 = vpack.c.bf16 %v4553_v38, %v3521_v45 }
 0x341   : > { %v3525_v28 = vpop.eup %3524  ;;  %3219 = vmatmul.mubr.msk.bf16.gmra.mrb[76].mxu1 %vm1812_vm3, %v1998_v2  ;;  %v2030_v2 = vunpack.c.h.bf16 %v2001_v7  ;;  %v2035_v11 = vunpack.c.l.bf16 %v2004_v5  ;;  %v2090_v30 = vsel %vm1812_vm3, %v2034_v13, 0.0  ;;  %v2036_v44 = vunpack.c.h.bf16 %v2004_v5 }
 0x342   : > { %v2067_v53 = vadd.f32 %v2066_v19, %v2065_v31  ;;  %3222 = vmatprep.mubr.msk.bf16.mxu1 %vm1812_vm3, %v1999_v57  ;;  %v2006_v39 = vpack.c.bf16 %v3525_v28, %v3523_v55  ;;  %v2031_v57 = vunpack.c.l.bf16 %v2002_v42  ;;  %v2037_v23 = vunpack.c.l.bf16 %v2005_v40 }
 0x343   : > { %v2082_v26 = vsel %vm1812_vm3, %v2030_v2, 0.0  ;;  %v2092_v54 = vsel %vm1812_vm3, %v2035_v11, 0.0  ;;  %v2094_v48 = vsel %vm1812_vm3, %v2036_v44, 0.0  ;;  %v2038_v41 = vunpack.c.h.bf16 %v2005_v40  ;;  %v4903_v11 = vld [vmem:[#allocation32_spill] sm:$0xff] }
 0x344   : > { %v2069_v3 = vadd.f32 %v2068_v63, %v2067_v53  ;;  %v2084_v16 = vsel %vm1812_vm3, %v2031_v57, 0.0  ;;  %v2096_v29 = vsel %vm1812_vm3, %v2037_v23, 0.0  ;;  %v2040_v43 = vunpack.c.h.bf16 %v2006_v39 }
 0x345   : > { %v2098_v4 = vsel %vm1812_vm3, %v2038_v41, 0.0  ;;  %v3756_v55 = vmov 0.0  }
 0x346   : > { %v2071_v18 = vadd.f32 %v2070_v10, %v2069_v3  ;;  %v2102_v19 = vsel %vm1812_vm3, %v2040_v43, 0.0  ;;  %v2007_v3 = vld [vmem:[#allocation3] sm:$0x1] }
 0x348   : > { %v2073_v58 = vadd.f32 %v2072_v14, %v2071_v18  ;;  %v2434_v14 = vpop.trf.xlu0 }
 0x349   : > { %3223 = vmatmul.mubr.msk.bf16.gmra.mrb[80].mxu1 %vm1812_vm3, %v2000_v52  ;;  %v2033_v52 = vunpack.c.l.bf16 %v2003_v33  ;;  %2474 = vmatprep.mubr.bf16.mxu0 %v2434_v14 }
 0x34a   : > { %v2075_v38 = vadd.f32 %v2074_v6, %v2073_v58  ;;  %3226 = vmatprep.mubr.msk.bf16.mxu1 %vm1812_vm3, %v2001_v7 }
 0x34b   : > { %v2088_v60 = vsel %vm1812_vm3, %v2033_v52, 0.0 }
 0x34c   : > { %v2077_v51 = vadd.f32 %v2076_v37, %v2075_v38 }
 0x34e   : > { %v2079_v20 = vadd.f32 %v2078_v0, %v2077_v51 }
 0x350   : > { %v2081_v49 = vadd.f32 %v2080_v21, %v2079_v20 }
 0x351   : > { %3227 = vmatmul.mubr.msk.bf16.gmra.mrb[84].mxu1 %vm1812_vm3, %v2002_v42 }
 0x352   : > { %v2083_v15 = vadd.f32 %v2082_v26, %v2081_v49  ;;  %3230 = vmatprep.mubr.msk.bf16.mxu1 %vm1812_vm3, %v2003_v33  ;;  %v2039_v33 = vunpack.c.l.bf16 %v2006_v39 }
 0x354   : > { %v2085_v24 = vadd.f32 %v2084_v16, %v2083_v15  ;;  %v2100_v31 = vsel %vm1812_vm3, %v2039_v33, 0.0 }
 0x356   : > { %v2087_v7 = vadd.f32 %v2086_v17, %v2085_v24  ;;  %v4901_v17 = vld [vmem:[#allocation30_spill] sm:$0xff] }
 0x358   : > { %v2089_v56 = vadd.f32 %v2088_v60, %v2087_v7  ;;  %v4902_v7 = vld [vmem:[#allocation31_spill] sm:$0xff] }
 0x359   : > { %3231 = vmatmul.mubr.msk.bf16.gmra.mrb[88].mxu1 %vm1812_vm3, %v2004_v5 }
 0x35a   : > { %v2091_v42 = vadd.f32 %v2090_v30, %v2089_v56  ;;  %3234 = vmatprep.mubr.msk.bf16.mxu1 %vm1812_vm3, %v2005_v40 }
 0x35c   : > { %v2093_v8 = vadd.f32 %v2092_v54, %v2091_v42  ;;  %v4904_v54 = vld [vmem:[#allocation33_spill] sm:$0xff] }
 0x35e   : > { %v2095_v36 = vadd.f32 %v2094_v48, %v2093_v8  ;;  %v4905_v48 = vld [vmem:[#allocation34_spill] sm:$0xff] }
 0x360   : > { %v2097_v45 = vadd.f32 %v2096_v29, %v2095_v36  ;;  %v4906_v29 = vld [vmem:[#allocation35_spill] sm:$0xff] }
 0x361   : > { %3235 = vmatmul.mubr.msk.bf16.gmra.mrb[92].mxu1 %vm1812_vm3, %v2006_v39  ;;  %v2008_v39 = vmul.f32 %v4548_v62, %v2007_v3 }
 0x362   : > { %v2099_v5 = vadd.f32 %v2098_v4, %v2097_v45  ;;  %3254 = vmatprep.mubr.msk.f32.mxu1 %vm3755_vm6, %v3756_v55  ;;  %v4907_v4 = vld [vmem:[#allocation36_spill] sm:$0xff] }
 0x364   : > { %v2101_v28 = vadd.f32 %v2100_v31, %v2099_v5 }
 0x366   : > { %v2103_v1 = vadd.f32 %v2102_v19, %v2101_v28  ;;  %v4908_v28 = vld [vmem:[#allocation37_spill] sm:$0xff] }
 0x368   : > { %v2104_v40 = vrot.slane %v2103_v1, 4 }
 0x369   : > { %3255 = vmatmul.mubr.msk.f32.vlgmr.msra.gmra.mrb[96].mxu1 %vm1812_vm3, %v4558_v25 }
 0x36a   : > { %v2105_v53 = vadd.f32 %v2104_v40, %v2103_v1  ;;  %v4909_v40 = vld [vmem:[#allocation38_spill] sm:$0xff] }
 0x36c   : > { %v2106_v63 = vrot.slane %v2105_v53, 2 }
 0x36e   : > { %v2107_v27 = vadd.f32 %v2106_v63, %v2105_v53 }
 0x370   : > { %v2108_v10 = vrot.slane %v2107_v27, 1 }
 0x372   : > { %v2109_v35 = vadd.f32 %v2108_v10, %v2107_v27  ;;  %v4910_v27 = vld [vmem:[#allocation39_spill] sm:$0xff] }
 0x374   : > { %v2110_v18 = vadd.f32 %v2109_v35, %v2008_v39  ;;  %v4911_v39 = vld [vmem:[#allocation40_spill] sm:$0xff] }
 0x376   : > { %2112 = vst.msk [vmem:[#allocation3] sm:$0x1] %vm2111_vm4, %v2110_v18 }
 0x3fc   : > { %v3208_v47 = vpop.f32.mrb[64].mxu1 }
 0x3fd   : > { %v2348_v58 = vmul.f32 %v3208_v47, %v4177_v61  ;;  %v2219_v6 = vpop.f32.mrb[65].mxu1  ;;  %v4898_v61 = vld [vmem:[#allocation27_spill] sm:$0xff] }
 0x3fe   : > { %v2346_v12 = vmul.f32 %v2219_v6, %v4181_v9  ;;  %v3209_v25 = vpop.f32.mrb[66].mxu1  ;;  %v4899_v9 = vld [vmem:[#allocation28_spill] sm:$0xff] }
 0x3ff   : > { %v2349_v38 = vmul.f32 %v3209_v25, %v4185_v22  ;;  %v2222_v37 = vpop.f32.mrb[67].mxu1  ;;  %v4913_v25 = vld [vmem:[#allocation42_spill] sm:$0xff] }
 0x400   : > { %v2347_v50 = vmul.f32 %v2222_v37, %v4189_v34  ;;  %v4900_v34 = vld [vmem:[#allocation29_spill] sm:$0xff] }
 0x401   : > { %v2379_v51 = vpack.c.bf16 %v2349_v38, %v2348_v58  ;;  %v4912_v58 = vld [vmem:[#allocation41_spill] sm:$0xff] }
 0x402   : > { %v2378_v62 = vpack.c.bf16 %v2347_v50, %v2346_v12  ;;  %v4914_v50 = vld [vmem:[#allocation43_spill] sm:$0xff] }
 0x404   : > { %v3212_v0 = vpop.f32.mrb[68].mxu1 }
 0x405   : > { %v4658_v2 = vmul.f32 %v3212_v0, %v4193_v46  ;;  %v2235_v20 = vpop.f32.mrb[69].mxu1 }
 0x406   : > { %v2350_v21 = vmul.f32 %v2235_v20, %v4197_v59  ;;  %v3213_v57 = vpop.f32.mrb[70].mxu1  ;;  %v4915_v20 = vld [vmem:[#allocation44_spill] sm:$0xff] }
 0x407   : > { %v2353_v49 = vmul.f32 %v3213_v57, %v4898_v61  ;;  %v2238_v26 = vpop.f32.mrb[71].mxu1 }
 0x408   : > { %v2351_v32 = vmul.f32 %v2238_v26, %v4899_v9  ;;  %v4916_v26 = vld [vmem:[#allocation45_spill] sm:$0xff] }
 0x409   : > { %v2381_v22 = vpack.c.bf16 %v2353_v49, %v4658_v2 }
 0x40a   : > { %v2380_v15 = vpack.c.bf16 %v2351_v32, %v2350_v21 }
 0x40c   : > { %v3216_v16 = vpop.f32.mrb[72].mxu1 }
 0x40d   : > { %v4665_v52 = vmul.f32 %v3216_v16, %v4900_v34  ;;  %v2251_v24 = vpop.f32.mrb[73].mxu1  ;;  %v4917_v16 = vld [vmem:[#allocation46_spill] sm:$0xff] }
 0x40e   : > { %v2354_v46 = vmul.f32 %v2251_v24, %v4901_v17  ;;  %v3217_v13 = vpop.f32.mrb[74].mxu1 }
 0x40f   : > { %v4669_v60 = vmul.f32 %v3217_v13, %v4902_v7  ;;  %v2254_v59 = vpop.f32.mrb[75].mxu1 }
 0x410   : > { %v2355_v56 = vmul.f32 %v2254_v59, %v4903_v11  ;;  %v4920_v59 = vld [vmem:[#allocation49_spill] sm:$0xff] }
 0x411   : > { %v2383_v30 = vpack.c.bf16 %v4669_v60, %v4665_v52  ;;  %v4918_v52 = vld [vmem:[#allocation47_spill] sm:$0xff] }
 0x412   : > { %v2382_v44 = vpack.c.bf16 %v2355_v56, %v2354_v46  ;;  %v4919_v46 = vld [vmem:[#allocation48_spill] sm:$0xff] }
 0x414   : > { %v3220_v42 = vpop.f32.mrb[76].mxu1 }
 0x415   : > { %v4675_v23 = vmul.f32 %v3220_v42, %v4904_v54  ;;  %v2267_v8 = vpop.f32.mrb[77].mxu1  ;;  %v4921_v42 = vld [vmem:[#allocation50_spill] sm:$0xff] }
 0x416   : > { %v2358_v41 = vmul.f32 %v2267_v8, %v4905_v48  ;;  %v3221_v36 = vpop.f32.mrb[78].mxu1 }
 0x417   : > { %v2361_v33 = vmul.f32 %v3221_v36, %v4906_v29  ;;  %v2270_v45 = vpop.f32.mrb[79].mxu1 }
 0x418   : > { %v2359_v43 = vmul.f32 %v2270_v45, %v4907_v4  ;;  %v2418_v4 = vpop.trf.xlu1 }
 0x419   : > { %v2385_v5 = vpack.c.bf16 %v2361_v33, %v4675_v23  ;;  %v4922_v23 = vld [vmem:[#allocation51_spill] sm:$0xff] }
 0x41a   : > { %v2384_v55 = vpack.c.bf16 %v2359_v43, %v2358_v41  ;;  %v4923_v41 = vld [vmem:[#allocation52_spill] sm:$0xff] }
 0x41c   : > { %v3224_v31 = vpop.f32.mrb[80].mxu1 }
 0x41d   : > { %v2364_v19 = vmul.f32 %v3224_v31, %v4908_v28  ;;  %v2283_v1 = vpop.f32.mrb[81].mxu1 }
 0x41e   : > { %v2362_v53 = vmul.f32 %v2283_v1, %v4909_v40  ;;  %v3225_v63 = vpop.f32.mrb[82].mxu1 }
 0x41f   : > { %v2365_v3 = vmul.f32 %v3225_v63, %v4910_v27  ;;  %v2286_v10 = vpop.f32.mrb[83].mxu1 }
 0x420   : > { %v2363_v35 = vmul.f32 %v2286_v10, %v4911_v39 }
 0x421   : > { %v2387_v18 = vpack.c.bf16 %v2365_v3, %v2364_v19 }
 0x422   : > { %v2386_v14 = vpack.c.bf16 %v2363_v35, %v2362_v53 }
 0x424   : > { %v3228_v47 = vpop.f32.mrb[84].mxu1  ;;  %3037 = vmatprep.subr.bf16.mxu0 %v2386_v14 }
 0x425   : > { %v2368_v6 = vmul.f32 %v3228_v47, %v4912_v58  ;;  %v2299_v12 = vpop.f32.mrb[85].mxu1  ;;  %3038 = vmatpush3.bf16.msra.mxu0 %v2378_v62 }
 0x426   : > { %v2366_v38 = vmul.f32 %v2299_v12, %v4913_v25  ;;  %v3229_v37 = vpop.f32.mrb[86].mxu1  ;;  %3039 = vmatprep.subr.bf16.mxu0 %v2387_v18 }
 0x427   : > { %v2369_v0 = vmul.f32 %v3229_v37, %v4914_v50  ;;  %v2302_v2 = vpop.f32.mrb[87].mxu1 }
 0x428   : > { %v2367_v21 = vmul.f32 %v2302_v2, %v4915_v20 }
 0x429   : > { %v2389_v57 = vpack.c.bf16 %v2369_v0, %v2368_v6  ;;  %3040 = vmatpush3.bf16.msra.mxu0 %v2379_v51 }
 0x42a   : > { %v2388_v61 = vpack.c.bf16 %v2367_v21, %v2366_v38 }
 0x42c   : > { %v3232_v49 = vpop.f32.mrb[88].mxu1  ;;  %3041 = vmatprep.subr.bf16.mxu0 %v2388_v61 }
 0x42d   : > { %v2372_v9 = vmul.f32 %v3232_v49, %v4916_v26  ;;  %v2315_v32 = vpop.f32.mrb[89].mxu1  ;;  %3042 = vmatpush3.bf16.msra.mxu0 %v2380_v15 }
 0x42e   : > { %v2370_v62 = vmul.f32 %v2315_v32, %v4917_v16  ;;  %v3233_v34 = vpop.f32.mrb[90].mxu1  ;;  %3043 = vmatprep.subr.bf16.mxu0 %v2389_v57 }
 0x42f   : > { %v2373_v24 = vmul.f32 %v3233_v34, %v4918_v52  ;;  %v2318_v17 = vpop.f32.mrb[91].mxu1 }
 0x430   : > { %v2371_v13 = vmul.f32 %v2318_v17, %v4919_v46 }
 0x431   : > { %v2391_v7 = vpack.c.bf16 %v2373_v24, %v2372_v9  ;;  %3044 = vmatpush3.bf16.msra.mxu0 %v2381_v22 }
 0x432   : > { %v2390_v60 = vpack.c.bf16 %v2371_v13, %v2370_v62 }
 0x434   : > { %v3236_v51 = vpop.f32.mrb[92].mxu1  ;;  %3045 = vmatprep.subr.bf16.mxu0 %v2390_v60 }
 0x435   : > { %v2376_v11 = vmul.f32 %v3236_v51, %v4920_v59  ;;  %v2331_v56 = vpop.f32.mrb[93].mxu1  ;;  %3046 = vmatpush3.bf16.msra.mxu0 %v2382_v44  ;;  %v2571_v44 = vld [vmem:[#allocation4] sm:$0xff] }
 0x436   : > { %v2374_v15 = vmul.f32 %v2331_v56, %v4921_v42  ;;  %v3237_v54 = vpop.f32.mrb[94].mxu1  ;;  %3047 = vmatprep.subr.bf16.mxu0 %v2391_v7 }
 0x437   : > { %v2377_v8 = vmul.f32 %v3237_v54, %v4922_v23  ;;  %v2334_v48 = vpop.f32.mrb[95].mxu1 }
 0x438   : > { %v2375_v36 = vmul.f32 %v2334_v48, %v4923_v41 }
 0x439   : > { %v2393_v29 = vpack.c.bf16 %v2377_v8, %v2376_v11  ;;  %3048 = vmatpush3.bf16.msra.mxu0 %v2383_v30  ;;  %v2580_v30 = vld [vmem:[#allocation2] sm:$0x1] (!%p2945_p4) }
 0x43a   : > { %v2392_v33 = vpack.c.bf16 %v2375_v36, %v2374_v15  ;;  %2581 = vst.msk [vmem:[%s407_s14] sm:$0x1] (!%p2945_p4), %vm2111_vm4, %v2580_v30 }
 0x43c   : > { %3049 = vmatprep.subr.bf16.mxu0 %v2392_v33  ;;  %v2567_v22 = vpop.f32.mrb[96].mxu1 }
 0x43d   : > { %3050 = vmatpush3.bf16.msra.mxu0 %v2384_v55  ;;  %v3256_v45 = vpop.f32.mrb[97].mxu1  ;;  %v2572_v28 = vmul.f32 %v2571_v44, %v2567_v22  ;;  %v2582_v55 = vld [vmem:[#allocation3] sm:$0x1] (!%p2945_p4) }
 0x43e   : > { %3051 = vmatprep.subr.bf16.mxu0 %v2393_v29  ;;  %2583 = vst.msk [vmem:[%s413_s28] sm:$0x1] (!%p2945_p4), %vm2111_vm4, %v2582_v55 }
 0x441   : > { %3052 = vmatpush3.bf16.msra.mxu0 %v2385_v5 }
 0x444   : > { %2475 = vmatmul.mubr.bf16.vlgmr.msra.gmra.mrb[96].mxu0 %v2418_v4 }
 0x517   : > { %v3053_v43 = vpop.f32.mrb[96].mxu0  ;;  %2579 = sbr.rel (%p2945_p4) target bundleno = 1318 (0x526), region = 64 }
 0x518   : > { %v3054_v31 = vpop.f32.mrb[97].mxu0 }
 0x519   : > { %v3055_v19 = vadd.f32 %v3054_v31, %v3053_v43  ;;  %v3056_v1 = vpop.f32.mrb[98].mxu0 }
 0x51a   : > { %v3057_v40 = vpop.f32.mrb[99].mxu0 }
 0x51b   : > { %v2573_v53 = vadd.f32 %v3055_v19, %v2572_v28 }
 0x51d   : > { %2574 = vst [vmem:[#allocation4] sm:$0xff] %v2573_v53 }
 0x524   : > { %v2584_v5 = vld [vmem:[#allocation4] sm:$0xff] }
 0x525   : > { %2585 = vst [vmem:[%s3967_s23] sm:$0xff] %v2584_v5 }
 0x526 PF: > { %s2590_s12 = sand.u32 1, %s3851_s17   ;;  %s2947_s26 = sshll.u32 %s3733_s13, 4 }
 0x527   : > { %s4710_s29 = scalar_lea.hbm %s4834_s8, %s2947_s26  ;;  %s2621_s16 = sshll.u32 %s413_s28, 4  ;;  %s4714_s16 = int_to_ptr.vmem [resolvable:$true] %s2621_s16 }
 0x528   : > { %s4719_s19 = scalar_lea.hbm %s4833_s7, %s2947_s26  ;;  %s4721_s25 = scalar_lea.sflag [#allocation12], %s2590_s12 }
 0x529   : > { %s3583_s17 = scalar_lea.vmem %s4714_s16, 16  ;;  %p4924_p6 = scmp.ne.s32.totalorder %s4856_s22, 0 }
 0x52a   : > { %p3584_p5 = scmp.ne.s32.totalorder %s4714_s16, %s3583_s17  ;;  %s3757_s21 = smov [#allocation11]  }
 0x52b   : > { %s3587_s20 = sshll.u32 %s3757_s21, 4  ;;  %s3588_s20 = int_to_ptr.vmem [resolvable:$false] %s3587_s20 }
 0x52c   : > { %p3585_p7 = pnand %p3584_p5, %p4924_p6  ;;  %s3589_s28 = scalar_lea.vmem %s3588_s20, 32 }
 0x52d   : > { %p3590_p11 = scmp.lt.s32.totalorder %s4714_s16, %s3588_s20  ;;  %p3591_p12 = scmp.lt.s32.totalorder %s3589_s28, %s3583_s17 }
 0x52e   : > { %p3586_p8 = pneg %p3585_p7 }
 0x52f   : > { %p3592_p3 = por %p3591_p12, %p3590_p11 }
 0x531   : > { %p3593_p9 = pnand %p3592_p3, %p3586_p8 }
 0x533   : > { %3596 = shalt.err (!%p3593_p9)
}
 0x534   : > { %s3597_s27 = scalar_lea.hbm %s4710_s29, 16  ;;  %s3601_s11 = scalar_lea.hbm %s4834_s8, 32 }
 0x535   : > { %p3598_p2 = scmp.ne.s32.totalorder %s4710_s29, %s3597_s27  ;;  %p3602_p0 = scmp.lt.u32.totalorder %s4710_s29, %s4834_s8 }
 0x536   : > { %p3603_p1 = scmp.lt.u32.totalorder %s3601_s11, %s3597_s27  ;;  %p3605_p5 = scmp.lt.u32.totalorder %s3597_s27, %s4710_s29 }
 0x537   : > { %p3599_p10 = pnand %p3598_p2, %p4924_p6 }
 0x538   : > { %p3604_p4 = por %p3603_p1, %p3602_p0 }
 0x539   : > { %p3600_p13 = pneg %p3599_p10 }
 0x53a   : > { %p3606_p7 = por %p3605_p5, %p3604_p4 }
 0x53c   : > { %p3607_p8 = pnand %p3606_p7, %p3600_p13 }
 0x53e   : > { %3610 = shalt.err (!%p3607_p8)
}
 0x53f   : > { %3283 = dma.vmem_to_hbm [thread:$0]  (%p4924_p6), %s4714_s16, 16, %s4710_s29, %s4721_s25  }
 0x540   : > { %s2608_s18 = sshll.u32 %s407_s14, 4  ;;  %s2949_s17 = sshll.u32 %s3733_s13, 7  ;;  %s4748_s18 = int_to_ptr.vmem [resolvable:$true] %s2608_s18 }
 0x541   : > { %s4753_s28 = scalar_lea.hbm %s4835_s9, %s2949_s17  ;;  %s2587_s27 = scalar_lea.sflag [#allocation7], %s3950_s30 }
 0x542   : > { %s3611_s12 = scalar_lea.vmem %s4748_s18, 16  ;;  %s3758_s29 = smov [#allocation10]  }
 0x543   : > { %p3612_p11 = scmp.ne.s32.totalorder %s4748_s18, %s3611_s12  ;;  %s3615_s16 = sshll.u32 %s3758_s29, 4  ;;  %s3616_s16 = int_to_ptr.vmem [resolvable:$false] %s3615_s16 }
 0x544   : > { %s3617_s13 = scalar_lea.vmem %s3616_s16, 32  ;;  %p3618_p9 = scmp.lt.s32.totalorder %s4748_s18, %s3616_s16 }
 0x545   : > { %p3613_p12 = pnand %p3612_p11, %p4924_p6  ;;  %p3619_p2 = scmp.lt.s32.totalorder %s3617_s13, %s3611_s12 }
 0x547   : > { %p3614_p3 = pneg %p3613_p12  ;;  %p3620_p10 = por %p3619_p2, %p3618_p9 }
 0x549   : > { %p3621_p13 = pnand %p3620_p10, %p3614_p3 }
 0x54b   : > { %3624 = shalt.err (!%p3621_p13)
}
 0x54c   : > { %s3625_s30 = scalar_lea.hbm %s4719_s19, 16  ;;  %s3629_s11 = scalar_lea.hbm %s4833_s7, 32 }
 0x54d   : > { %p3626_p0 = scmp.ne.s32.totalorder %s4719_s19, %s3625_s30  ;;  %p3630_p5 = scmp.lt.u32.totalorder %s4719_s19, %s4833_s7 }
 0x54e   : > { %p3631_p7 = scmp.lt.u32.totalorder %s3629_s11, %s3625_s30  ;;  %p3633_p11 = scmp.lt.u32.totalorder %s3625_s30, %s4719_s19 }
 0x54f   : > { %p3627_p1 = pnand %p3626_p0, %p4924_p6 }
 0x550   : > { %p3632_p8 = por %p3631_p7, %p3630_p5 }
 0x551   : > { %p3628_p4 = pneg %p3627_p1 }
 0x552   : > { %p3634_p12 = por %p3633_p11, %p3632_p8 }
 0x554   : > { %p3635_p3 = pnand %p3634_p12, %p3628_p4 }
 0x556   : > { %3638 = shalt.err (!%p3635_p3)
}
 0x557   : > { %3282 = dma.vmem_to_hbm [thread:$0]  (%p4924_p6), %s4748_s18, 16, %s4719_s19, %s2587_s27  }
 0x558   : > { %s2634_s17 = sshll.u32 %s3967_s23, 4  ;;  %s3759_s20 = smov [#allocation13]   ;;  %s2635_s17 = int_to_ptr.vmem [resolvable:$true] %s2634_s17 }
 0x559   : > { %s3639_s21 = scalar_lea.vmem %s2635_s17, 128  ;;  %s3643_s12 = sshll.u32 %s3759_s20, 4  ;;  %s3644_s12 = int_to_ptr.vmem [resolvable:$false] %s3643_s12 }
 0x55a   : > { %p3640_p9 = scmp.ne.s32.totalorder %s2635_s17, %s3639_s21  ;;  %s3645_s29 = scalar_lea.vmem %s3644_s12, 256 }
 0x55b   : > { %p3646_p13 = scmp.lt.s32.totalorder %s2635_s17, %s3644_s12  ;;  %p3647_p0 = scmp.lt.s32.totalorder %s3645_s29, %s3639_s21 }
 0x55c   : > { %p3641_p2 = pnand %p3640_p9, %p4924_p6 }
 0x55d   : > { %p3648_p1 = por %p3647_p0, %p3646_p13 }
 0x55e   : > { %p3642_p10 = pneg %p3641_p2 }
 0x560   : > { %p3649_p4 = pnand %p3648_p1, %p3642_p10 }
 0x562   : > { %3652 = shalt.err (!%p3649_p4)
}
 0x563   : > { %s3653_s23 = scalar_lea.hbm %s4753_s28, 128  ;;  %s3657_s27 = scalar_lea.hbm %s4835_s9, 256 }
 0x564   : > { %p3654_p5 = scmp.ne.s32.totalorder %s4753_s28, %s3653_s23  ;;  %p3658_p11 = scmp.lt.u32.totalorder %s4753_s28, %s4835_s9 }
 0x565   : > { %p3659_p12 = scmp.lt.u32.totalorder %s3657_s27, %s3653_s23  ;;  %p3661_p9 = scmp.lt.u32.totalorder %s3653_s23, %s4753_s28 }
 0x566   : > { %p3655_p7 = pnand %p3654_p5, %p4924_p6 }
 0x567   : > { %p3660_p3 = por %p3659_p12, %p3658_p11 }
 0x568   : > { %p3656_p8 = pneg %p3655_p7 }
 0x569   : > { %p3662_p2 = por %p3661_p9, %p3660_p3 }
 0x56b   : > { %p3663_p10 = pnand %p3662_p2, %p3656_p8 }
 0x56d   : > { %3666 = shalt.err (!%p3663_p10)
}
 0x56e   : > { %3284 = dma.vmem_to_hbm [thread:$0]  (%p4924_p6), %s2635_s17, 128, %s4753_s28, %s4721_s25  }
 0x56f PF: > { %s4925_s30 = sld [smem:[#allocation22_spill]]  ;;  %s4926_s14 = sld [smem:[#allocation18_spill]] }
 0x570   : > { %s4927_s26 = sld [smem:[#allocation25_spill]] }
 0x575   : > { %p3309_p13 = scmp.ge.s32.totalorder %s4925_s30, 2  ;;  %s2646_s11 = sand.u32 1, %s4926_s14  }
 0x576   : > { %p4928_p0 = scmp.ne.s32.totalorder %s4927_s26, 0  ;;  %s2647_s24 = scalar_lea.sflag [#allocation7], %s2646_s11 }
 0x578   : > { %p3296_p1 = pnand %p3309_p13, %p4928_p0 }
 0x57a   : > { %3708 = dma.done.wait (!%p3296_p1), %s2647_s24, 16  }
 0x57b   : > { %3710 = vsyncadd (!%p3296_p1), %s2647_s24, 4294967280  ;;  %s4929_s15 = sadd.s32 4294967294, %s4925_s30  }
 0x57c   : > { %s2654_s21 = sand.u32 1, %s4929_s15  }
 0x57d   : > { %s2655_s20 = scalar_lea.sflag [#allocation12], %s2654_s21 }
 0x57e   : > { %3712 = dma.done.wait (!%p3296_p1), %s2655_s20, 144  }
 0x57f   : > { %3714 = vsyncadd (!%p3296_p1), %s2655_s20, 4294967152  ;;  %s28_s16 = sadd.s32 1, %s4925_s30   ;;  %s4930_s22 = sld [smem:[#allocation19_spill]] }
 0x580   : > { %p25_p6 = scmp.ge.s32.totalorder %s28_s16, 6   ;;  %s4931_s11 = sld [smem:[#allocation26_spill]] }
 0x581   : > { %s4932_s12 = sld [smem:[#allocation20_spill]]  ;;  %s4933_s13 = sld [smem:[#allocation21_spill]] }
 0x582   : > { %s4934_s14 = sld [smem:[#allocation23_spill]]  ;;  %s4935_s15 = sld [smem:[#allocation24_spill]] }
 0x583   : > { %s4936_s30 = smov %s3721_s10  ;;  %27 = sbr.rel (!%p25_p6) target bundleno = 9 (0x9), region = 135 }
 0x585   : > { %s4937_s10 = smov %s4930_s22 }
 0x58a   :  { %2668 = vsyncpa [#allocation6], 1 }
 0x58b   :  { %2670 = vsyncpa [#allocation6 + $0x1], 1 }
 0x58c   :  { %2671 = vsyncpa [#allocation9], 1 }
 0x58d   :  { %2672 = vsyncpa [#allocation7], 1 }
 0x58e   :  { %2674 = vsyncpa [#allocation7 + $0x1], 1 }
 0x58f   :  { %2675 = vsyncpa [#allocation12], 1 }
 0x590   :  { %2677 = vsyncpa [#allocation12 + $0x1], 1 }

</bundles_post_ra>
